<compile_context>
chip_gen: v7x
topology: tpu7x:2x2x1
jax: 0.10.0
libtpu: 0.0.40
codegen_flags: <defaults>
</compile_context>

<pallas_src>
import functools

import jax
import jax.numpy as jnp
from jax import lax
from jax.experimental import pallas as pl
from jax.experimental.pallas import tpu as pltpu


def _conv_relu_kernel(x_ref, w_ref, b_ref, o_ref, *scratch, K, stride, Cin,
                      Wo, tile_ho, single_spatial, relu, use_col_cache):
    # x_ref: (1, s*s*Cin, Hph, Wph)  padded (+ phase-split) input, compute dtype
    # w_ref: (Cout_blk, K*K*Cin)     pre-fused weights, compute dtype
    # b_ref: (Cout_blk, 1)           f32 bias
    # o_ref: (1, Cout_blk, tile_ho*Wo)  lane-dense output tile
    # scratch[0] (if use_col_cache): VMEM (K*K*Cin, tile_ho*Wo) cached im2col slab
    tile_hw = tile_ho * Wo
    cout_blk = o_ref.shape[1]

    if single_spatial:
        r0 = 0
    else:
        r0 = pl.program_id(1) * tile_ho
        if tile_ho % 8 == 0:
            r0 = pl.multiple_of(r0, 8)

    def load_tap(dy, dx):
        # Phase split done in the wrapper -> all slices here are unit-stride.
        py, px = dy % stride, dx % stride
        oy, ox = dy // stride, dx // stride
        cb = (py * stride + px) * Cin
        t = x_ref[0, cb:cb + Cin, pl.ds(oy + r0, tile_ho), ox:ox + Wo]
        return t.reshape(Cin, tile_hw)

    if use_col_cache:
        col_ref = scratch[0]

        # Build the (K*K*Cin, tile_hw) slab ONCE per (image, spatial tile) and
        # reuse it for every Cout tile (Cout axis is "arbitrary").
        @pl.when(pl.program_id(2) == 0)
        def _build_col():
            for dy in range(K):
                for dx in range(K):
                    kk = dy * K + dx
                    col_ref[kk * Cin:(kk + 1) * Cin, :] = load_tap(dy, dx)

        acc = jnp.dot(w_ref[...], col_ref[...],
                      preferred_element_type=jnp.float32)
    else:
        # Large-Cin path: per-tap MXU matmuls accumulated in f32 (no slab).
        acc = jnp.zeros((cout_blk, tile_hw), jnp.float32)
        for dy in range(K):
            for dx in range(K):
                kk = dy * K + dx
                acc = acc + jnp.dot(w_ref[:, kk * Cin:(kk + 1) * Cin],
                                    load_tap(dy, dx),
                                    preferred_element_type=jnp.float32)

    acc = acc + b_ref[...]              # (Cout_blk, 1) broadcasts over lanes
    if relu:
        acc = jnp.maximum(acc, 0.0)
    o_ref[...] = acc.reshape(1, cout_blk, tile_hw).astype(o_ref.dtype)


def _vmem_limit_bytes():
    cap = 64 << 20
    try:
        info = pltpu.get_tpu_info()
        cap = int(getattr(info, "vmem_capacity_bytes", cap)) or cap
    except Exception:
        pass
    # Leave headroom for compiler scratch; 96 MiB on v5e/v6e, 48 MiB on v7x.
    return min((cap * 3) // 4, 96 << 20)


def conv_relu(x, w, b, *, stride=1, pd=True, relu=True,
              compute_dtype=jnp.float32, out_dtype=None,
              cout_block=None, tile_ho=None, use_col_cache=None):
    """ConvReLU(in_ch, out_ch, k, stride, relu, pd, bn=False).forward(x).

    x: (N, Cin, H, W), w: (Cout, Cin, K, K) OIHW, b: (Cout,).
    compute_dtype: MXU operand dtype (bf16 recommended on v6e/v7x); f32 accum.
    """
    N, Cin, H, W = x.shape
    Cout, Cin_w, K, K2 = w.shape
    assert Cin_w == Cin and K == K2
    s = int(stride)
    pad = (K - 1) // 2 if pd else 0     # == nn.Conv2d padding=int((k-1)/2)
    Hp, Wp = H + 2 * pad, W + 2 * pad
    Ho = (Hp - K) // s + 1
    Wo = (Wp - K) // s + 1
    out_dtype = x.dtype if out_dtype is None else out_dtype
    is_bf16 = jnp.dtype(compute_dtype) == jnp.dtype(jnp.bfloat16)
    c_bytes = jnp.dtype(compute_dtype).itemsize
    o_bytes = jnp.dtype(out_dtype).itemsize

    # ---- wrapper-side prep: pad + stride^2 phase split + cast ---------------
    Hph, Wph = -(-Hp // s), -(-Wp // s)
    eh, ew = Hph * s - Hp, Wph * s - Wp
    xp = jnp.pad(x, ((0, 0), (0, 0), (pad, pad + eh), (pad, pad + ew)))
    xp = xp.astype(compute_dtype)
    if s == 1:
        xph = xp                                         # (N, Cin, Hp, Wp)
    else:
        xph = (xp.reshape(N, Cin, Hph, s, Wph, s)
                 .transpose(0, 3, 5, 1, 2, 4)
                 .reshape(N, s * s * Cin, Hph, Wph))     # unit-stride taps
    PCin = s * s * Cin

    # Fused weights: (Cout, K*K*Cin), row order (dy, dx, cin) == slab order.
    w2 = jnp.transpose(w, (0, 2, 3, 1)).reshape(Cout, K * K * Cin)
    w2 = w2.astype(compute_dtype)
    b2 = b.reshape(Cout, 1).astype(jnp.float32)

    # ---- Cout tiling ---------------------------------------------------------
    if cout_block is None:
        if Cout <= 128:
            cout_block = Cout
        elif is_bf16 and Cout % 256 == 0:
            cout_block = 256        # v6e/v7x 2x256^2 MXU; pass 128 on v5e
        elif Cout % 128 == 0:
            cout_block = 128
        else:
            cout_block = Cout
    assert Cout % cout_block == 0
    sub = 16 if is_bf16 else 8      # bf16 packs 2 rows per sublane
    assert cout_block == Cout or cout_block % sub == 0
    n_cout = Cout // cout_block

    if use_col_cache is None:
        # Per-tap accumulation once each tap already has a deep contraction.
        use_col_cache = Cin < (64 if is_bf16 else 128)

    # ---- spatial (output-row) tiling, sized for this chip's VMEM ------------
    vmem_limit = _vmem_limit_bytes()
    budget = (vmem_limit * 3) // 5

    def est_bytes(t_ho):
        t_hw = t_ho * Wo
        xb = PCin * Hph * Wph * c_bytes
        wb = cout_block * K * K * Cin * c_bytes
        ob = cout_block * t_hw * o_bytes
        col = K * K * Cin * t_hw * c_bytes if use_col_cache else 0
        tmp = cout_block * t_hw * 4 + 2 * Cin * t_hw * c_bytes
        return 2 * xb + 2 * wb + 2 * ob + col + tmp + 2 * cout_block * 4

    if tile_ho is None:
        cands = [t for t in range(Ho, 0, -1)
                 if Ho % t == 0 and (t == Ho or (t * Wo) % 128 == 0)]
        tile_ho = cands[-1]
        for t in cands:
            if est_bytes(t) <= budget:
                tile_ho = t
                break
    assert Ho % tile_ho == 0
    assert tile_ho == Ho or (tile_ho * Wo) % 128 == 0
    n_ho = Ho // tile_ho
    tile_hw = tile_ho * Wo
    # TODO(synk): if a full padded image (PCin,Hph,Wph) itself overflows VMEM,
    # add halo-based H tiling of the *input* via manual DMA as well.
    # TODO(synk): for weight-heavy layers, flip grid to (n_cout, N, n_ho) so
    # weights stay resident and activations re-stream.

    kernel = functools.partial(
        _conv_relu_kernel, K=K, stride=s, Cin=Cin, Wo=Wo, tile_ho=tile_ho,
        single_spatial=(n_ho == 1), relu=relu, use_col_cache=use_col_cache)

    scratch_shapes = []
    if use_col_cache:
        scratch_shapes.append(pltpu.VMEM((K * K * Cin, tile_hw), compute_dtype))

    out = pl.pallas_call(
        kernel,
        out_shape=jax.ShapeDtypeStruct((N, Cout, Ho * Wo), out_dtype),
        grid_spec=pltpu.PrefetchScalarGridSpec(
            num_scalar_prefetch=0,
            grid=(N, n_ho, n_cout),
            in_specs=[
                # full (padded) image; indexed only by n -> resident across h,j
                pl.BlockSpec((1, PCin, Hph, Wph), lambda n, h, j: (n, 0, 0, 0)),
                pl.BlockSpec((cout_block, K * K * Cin), lambda n, h, j: (j, 0)),
                pl.BlockSpec((cout_block, 1), lambda n, h, j: (j, 0)),
            ],
            out_specs=pl.BlockSpec((1, cout_block, tile_hw),
                                   lambda n, h, j: (n, j, h)),
            scratch_shapes=scratch_shapes,
        ),
        compiler_params=pltpu.CompilerParams(
            # Cout axis "arbitrary": cached col slab is rebuilt at
            # program_id(2)==0 and reused for the remaining Cout tiles.
            dimension_semantics=("parallel", "parallel", "arbitrary"),
            vmem_limit_bytes=int(vmem_limit)),
    )(xph, w2, b2)

    return out.reshape(N, Cout, Ho, Wo)     # free metadata reshape to NCHW


def _reference(x, w, b, *, stride=1, pd=True, relu=True):
    K = w.shape[2]
    padding = (K - 1) // 2 if pd else 0
    y = lax.conv_general_dilated(
        x, w, window_strides=(stride, stride),
        padding=[(padding, padding), (padding, padding)],
        dimension_numbers=("NCHW", "OIHW", "NCHW"))
    y = y + b.reshape(1, -1, 1, 1)
    if relu:
        y = jnp.maximum(y, 0.0)
    return y


if __name__ == "__main__":
    # ConvReLU(in_ch=4, out_ch=8, kernel_sz=3) -- stride=1, relu=True, pd=True, bn=False
    N, Cin, H, W = 2, 4, 16, 16
    Cout, K = 8, 3

    key = jax.random.PRNGKey(0)
    kx, kw, kb, kw2, kb2 = jax.random.split(key, 5)
    x = jax.random.normal(kx, (N, Cin, H, W), dtype=jnp.float32)
    w = jax.random.normal(kw, (Cout, Cin, K, K), dtype=jnp.float32) * 0.1
    b = jax.random.normal(kb, (Cout,), dtype=jnp.float32) * 0.1

    def check(out, ref, tol):
        assert out.shape == ref.shape, (out.shape, ref.shape)
        err = float(jnp.max(jnp.abs(out - ref)))
        assert err <= tol, err

    # 1) default: stride=1, pad, relu, f32, cached col slab, single spatial tile
    ref = jax.block_until_ready(_reference(x, w, b, stride=1, pd=True, relu=True))
    check(jax.block_until_ready(conv_relu(x, w, b)), ref, 1e-4)

    # 2) bf16 MXU operands (v6e/v7x fast path), f32 accumulation
    check(jax.block_until_ready(conv_relu(x, w, b, compute_dtype=jnp.bfloat16)),
          ref, 5e-2)

    # 3) forced spatial tiling (tile_ho=8 -> 128-lane output tiles, n_ho=2)
    check(jax.block_until_ready(conv_relu(x, w, b, tile_ho=8)), ref, 1e-4)

    # 4) per-tap accumulation path (no cached col slab)
    check(jax.block_until_ready(conv_relu(x, w, b, use_col_cache=False)),
          ref, 1e-4)

    # 5) Cout tiling: cached slab reused across Cout tiles (j > 0)
    w16 = jax.random.normal(kw2, (16, Cin, K, K), dtype=jnp.float32) * 0.1
    b16 = jax.random.normal(kb2, (16,), dtype=jnp.float32) * 0.1
    ref16 = jax.block_until_ready(_reference(x, w16, b16, stride=1, pd=True, relu=True))
    check(jax.block_until_ready(conv_relu(x, w16, b16, cout_block=8)),
          ref16, 1e-4)

    # 6) stride=2 via wrapper-side stride^2 phase split (unit-stride in kernel)
    ref_s2 = jax.block_until_ready(_reference(x, w, b, stride=2, pd=True, relu=True))
    check(jax.block_until_ready(conv_relu(x, w, b, stride=2)), ref_s2, 1e-4)

    # 7) pd=False, relu=False
    ref_np = jax.block_until_ready(_reference(x, w, b, stride=1, pd=False, relu=False))
    check(jax.block_until_ready(conv_relu(x, w, b, pd=False, relu=False)),
          ref_np, 1e-4)

    print("KERNEL_OK")
</pallas_src>

<mosaic_0001>
module attributes {stable_mosaic.version = 11 : i64} {
  func.func @_conv_relu_kernel(%arg0: i32, %arg1: i32, %arg2: i32, %arg3: memref<1x4x18x18xf32, #tpu.memory_space<vmem>>, %arg4: memref<8x36xf32, #tpu.memory_space<vmem>>, %arg5: memref<8x1xf32, #tpu.memory_space<vmem>>, %arg6: memref<1x8x256xf32, #tpu.memory_space<vmem>>, %arg7: memref<36x256xf32, #tpu.memory_space<vmem>>) attributes {dimension_semantics = [#tpu.dimension_semantics<parallel>, #tpu.dimension_semantics<parallel>, #tpu.dimension_semantics<arbitrary>], iteration_bounds = array<i64: 2, 1, 1>, scalar_prefetch = 0 : i64, scratch_operands = 1 : i64, tpu.core_type = #tpu.core_type<tc>, window_params = [{transform_indices = @transform_0, window_bounds = array<i64: 1, 4, 18, 18>}, {transform_indices = @transform_1, window_bounds = array<i64: 8, 36>}, {transform_indices = @transform_2, window_bounds = array<i64: 8, 1>}, {transform_indices = @transform_3, window_bounds = array<i64: 1, 8, 256>}]} {
    %c0_i32 = arith.constant 0 : i32
    %0 = arith.cmpi eq, %arg2, %c0_i32 : i32
    %1 = arith.extui %0 : i1 to i32
    %c0_i32_0 = arith.constant 0 : i32
    %2 = arith.cmpi ne, %1, %c0_i32_0 : i32
    scf.if %2 {
      %c0_10 = arith.constant 0 : index
      %c0_11 = arith.constant 0 : index
      %c0_12 = arith.constant 0 : index
      %c0_13 = arith.constant 0 : index
      %13 = vector.load %arg3[%c0_10, %c0_11, %c0_12, %c0_13] : memref<1x4x18x18xf32, #tpu.memory_space<vmem>>, vector<1x4x16x16xf32>
      %14 = vector.shape_cast %13 : vector<1x4x16x16xf32> to vector<4x16x16xf32>
      %15 = vector.shape_cast %14 : vector<4x16x16xf32> to vector<4x256xf32>
      %c0_14 = arith.constant 0 : index
      %c0_15 = arith.constant 0 : index
      %16 = vector.load %arg7[%c0_14, %c0_15] : memref<36x256xf32, #tpu.memory_space<vmem>>, vector<4x256xf32>
      tpu.vector_store %arg7[%c0_14, %c0_15], %15 {strides = array<i32>} : memref<36x256xf32, #tpu.memory_space<vmem>>, vector<4x256xf32>,
      %c0_16 = arith.constant 0 : index
      %c0_17 = arith.constant 0 : index
      %c0_18 = arith.constant 0 : index
      %c1 = arith.constant 1 : index
      %17 = vector.load %arg3[%c0_16, %c0_17, %c0_18, %c1] : memref<1x4x18x18xf32, #tpu.memory_space<vmem>>, vector<1x4x16x16xf32>
      %18 = vector.shape_cast %17 : vector<1x4x16x16xf32> to vector<4x16x16xf32>
      %19 = vector.shape_cast %18 : vector<4x16x16xf32> to vector<4x256xf32>
      %c4 = arith.constant 4 : index
      %c0_19 = arith.constant 0 : index
      %20 = vector.load %arg7[%c4, %c0_19] : memref<36x256xf32, #tpu.memory_space<vmem>>, vector<4x256xf32>
      tpu.vector_store %arg7[%c4, %c0_19], %19 {strides = array<i32>} : memref<36x256xf32, #tpu.memory_space<vmem>>, vector<4x256xf32>,
      %c0_20 = arith.constant 0 : index
      %c0_21 = arith.constant 0 : index
      %c0_22 = arith.constant 0 : index
      %c2 = arith.constant 2 : index
      %21 = vector.load %arg3[%c0_20, %c0_21, %c0_22, %c2] : memref<1x4x18x18xf32, #tpu.memory_space<vmem>>, vector<1x4x16x16xf32>
      %22 = vector.shape_cast %21 : vector<1x4x16x16xf32> to vector<4x16x16xf32>
      %23 = vector.shape_cast %22 : vector<4x16x16xf32> to vector<4x256xf32>
      %c8 = arith.constant 8 : index
      %c0_23 = arith.constant 0 : index
      %24 = vector.load %arg7[%c8, %c0_23] : memref<36x256xf32, #tpu.memory_space<vmem>>, vector<4x256xf32>
      tpu.vector_store %arg7[%c8, %c0_23], %23 {strides = array<i32>} : memref<36x256xf32, #tpu.memory_space<vmem>>, vector<4x256xf32>,
      %c0_24 = arith.constant 0 : index
      %c0_25 = arith.constant 0 : index
      %c1_26 = arith.constant 1 : index
      %c0_27 = arith.constant 0 : index
      %25 = vector.load %arg3[%c0_24, %c0_25, %c1_26, %c0_27] : memref<1x4x18x18xf32, #tpu.memory_space<vmem>>, vector<1x4x16x16xf32>
      %26 = vector.shape_cast %25 : vector<1x4x16x16xf32> to vector<4x16x16xf32>
      %27 = vector.shape_cast %26 : vector<4x16x16xf32> to vector<4x256xf32>
      %c12 = arith.constant 12 : index
      %c0_28 = arith.constant 0 : index
      %28 = vector.load %arg7[%c12, %c0_28] : memref<36x256xf32, #tpu.memory_space<vmem>>, vector<4x256xf32>
      tpu.vector_store %arg7[%c12, %c0_28], %27 {strides = array<i32>} : memref<36x256xf32, #tpu.memory_space<vmem>>, vector<4x256xf32>,
      %c0_29 = arith.constant 0 : index
      %c0_30 = arith.constant 0 : index
      %c1_31 = arith.constant 1 : index
      %c1_32 = arith.constant 1 : index
      %29 = vector.load %arg3[%c0_29, %c0_30, %c1_31, %c1_32] : memref<1x4x18x18xf32, #tpu.memory_space<vmem>>, vector<1x4x16x16xf32>
      %30 = vector.shape_cast %29 : vector<1x4x16x16xf32> to vector<4x16x16xf32>
      %31 = vector.shape_cast %30 : vector<4x16x16xf32> to vector<4x256xf32>
      %c16 = arith.constant 16 : index
      %c0_33 = arith.constant 0 : index
      %32 = vector.load %arg7[%c16, %c0_33] : memref<36x256xf32, #tpu.memory_space<vmem>>, vector<4x256xf32>
      tpu.vector_store %arg7[%c16, %c0_33], %31 {strides = array<i32>} : memref<36x256xf32, #tpu.memory_space<vmem>>, vector<4x256xf32>,
      %c0_34 = arith.constant 0 : index
      %c0_35 = arith.constant 0 : index
      %c1_36 = arith.constant 1 : index
      %c2_37 = arith.constant 2 : index
      %33 = vector.load %arg3[%c0_34, %c0_35, %c1_36, %c2_37] : memref<1x4x18x18xf32, #tpu.memory_space<vmem>>, vector<1x4x16x16xf32>
      %34 = vector.shape_cast %33 : vector<1x4x16x16xf32> to vector<4x16x16xf32>
      %35 = vector.shape_cast %34 : vector<4x16x16xf32> to vector<4x256xf32>
      %c20 = arith.constant 20 : index
      %c0_38 = arith.constant 0 : index
      %36 = vector.load %arg7[%c20, %c0_38] : memref<36x256xf32, #tpu.memory_space<vmem>>, vector<4x256xf32>
      tpu.vector_store %arg7[%c20, %c0_38], %35 {strides = array<i32>} : memref<36x256xf32, #tpu.memory_space<vmem>>, vector<4x256xf32>,
      %c0_39 = arith.constant 0 : index
      %c0_40 = arith.constant 0 : index
      %c2_41 = arith.constant 2 : index
      %c0_42 = arith.constant 0 : index
      %37 = vector.load %arg3[%c0_39, %c0_40, %c2_41, %c0_42] : memref<1x4x18x18xf32, #tpu.memory_space<vmem>>, vector<1x4x16x16xf32>
      %38 = vector.shape_cast %37 : vector<1x4x16x16xf32> to vector<4x16x16xf32>
      %39 = vector.shape_cast %38 : vector<4x16x16xf32> to vector<4x256xf32>
      %c24 = arith.constant 24 : index
      %c0_43 = arith.constant 0 : index
      %40 = vector.load %arg7[%c24, %c0_43] : memref<36x256xf32, #tpu.memory_space<vmem>>, vector<4x256xf32>
      tpu.vector_store %arg7[%c24, %c0_43], %39 {strides = array<i32>} : memref<36x256xf32, #tpu.memory_space<vmem>>, vector<4x256xf32>,
      %c0_44 = arith.constant 0 : index
      %c0_45 = arith.constant 0 : index
      %c2_46 = arith.constant 2 : index
      %c1_47 = arith.constant 1 : index
      %41 = vector.load %arg3[%c0_44, %c0_45, %c2_46, %c1_47] : memref<1x4x18x18xf32, #tpu.memory_space<vmem>>, vector<1x4x16x16xf32>
      %42 = vector.shape_cast %41 : vector<1x4x16x16xf32> to vector<4x16x16xf32>
      %43 = vector.shape_cast %42 : vector<4x16x16xf32> to vector<4x256xf32>
      %c28 = arith.constant 28 : index
      %c0_48 = arith.constant 0 : index
      %44 = vector.load %arg7[%c28, %c0_48] : memref<36x256xf32, #tpu.memory_space<vmem>>, vector<4x256xf32>
      tpu.vector_store %arg7[%c28, %c0_48], %43 {strides = array<i32>} : memref<36x256xf32, #tpu.memory_space<vmem>>, vector<4x256xf32>,
      %c0_49 = arith.constant 0 : index
      %c0_50 = arith.constant 0 : index
      %c2_51 = arith.constant 2 : index
      %c2_52 = arith.constant 2 : index
      %45 = vector.load %arg3[%c0_49, %c0_50, %c2_51, %c2_52] : memref<1x4x18x18xf32, #tpu.memory_space<vmem>>, vector<1x4x16x16xf32>
      %46 = vector.shape_cast %45 : vector<1x4x16x16xf32> to vector<4x16x16xf32>
      %47 = vector.shape_cast %46 : vector<4x16x16xf32> to vector<4x256xf32>
      %c32 = arith.constant 32 : index
      %c0_53 = arith.constant 0 : index
      %48 = vector.load %arg7[%c32, %c0_53] : memref<36x256xf32, #tpu.memory_space<vmem>>, vector<4x256xf32>
      tpu.vector_store %arg7[%c32, %c0_53], %47 {strides = array<i32>} : memref<36x256xf32, #tpu.memory_space<vmem>>, vector<4x256xf32>,
    } else {
    }
    %c0 = arith.constant 0 : index
    %c0_1 = arith.constant 0 : index
    %3 = vector.load %arg4[%c0, %c0_1] : memref<8x36xf32, #tpu.memory_space<vmem>>, vector<8x36xf32>
    %c0_2 = arith.constant 0 : index
    %c0_3 = arith.constant 0 : index
    %4 = vector.load %arg7[%c0_2, %c0_3] : memref<36x256xf32, #tpu.memory_space<vmem>>, vector<36x256xf32>
    %cst = arith.constant dense<0.000000e+00> : vector<8x256xf32>
    %5 = tpu.matmul %3, %4, %cst {dimension_numbers = #tpu.dot_dimension_numbers<[1], [0], [0], [1], [0, 0, 1, 1], [], []>} : vector<8x36xf32>, vector<36x256xf32>, vector<8x256xf32> -> vector<8x256xf32>
    %c0_4 = arith.constant 0 : index
    %c0_5 = arith.constant 0 : index
    %6 = vector.load %arg5[%c0_4, %c0_5] : memref<8x1xf32, #tpu.memory_space<vmem>>, vector<8x1xf32>
    %7 = vector.broadcast %6 : vector<8x1xf32> to vector<8x256xf32>
    %8 = arith.addf %5, %7 : vector<8x256xf32>
    %cst_6 = arith.constant 0.000000e+00 : f32
    %9 = vector.broadcast %cst_6 : f32 to vector<8x256xf32>
    %10 = arith.maximumf %8, %9 : vector<8x256xf32>
    %11 = vector.shape_cast %10 : vector<8x256xf32> to vector<1x8x256xf32>
    %c0_7 = arith.constant 0 : index
    %c0_8 = arith.constant 0 : index
    %c0_9 = arith.constant 0 : index
    %12 = vector.load %arg6[%c0_7, %c0_8, %c0_9] : memref<1x8x256xf32, #tpu.memory_space<vmem>>, vector<1x8x256xf32>
    tpu.vector_store %arg6[%c0_7, %c0_8, %c0_9], %11 {strides = array<i32>} : memref<1x8x256xf32, #tpu.memory_space<vmem>>, vector<1x8x256xf32>,
    return
  }
  func.func @transform_0(%arg0: i32, %arg1: i32, %arg2: i32) -> (i32, i32, i32, i32) {
    %c0_i32 = arith.constant 0 : i32
    %c0_i32_0 = arith.constant 0 : i32
    %c0_i32_1 = arith.constant 0 : i32
    %c0_i32_2 = arith.constant 0 : i32
    return %arg0, %c0_i32, %c0_i32_0, %c0_i32_1 : i32, i32, i32, i32
  }
  func.func @transform_1(%arg0: i32, %arg1: i32, %arg2: i32) -> (i32, i32) {
    %c0_i32 = arith.constant 0 : i32
    %c0_i32_0 = arith.constant 0 : i32
    return %arg2, %c0_i32 : i32, i32
  }
  func.func @transform_2(%arg0: i32, %arg1: i32, %arg2: i32) -> (i32, i32) {
    %c0_i32 = arith.constant 0 : i32
    %c0_i32_0 = arith.constant 0 : i32
    return %arg2, %c0_i32 : i32, i32
  }
  func.func @transform_3(%arg0: i32, %arg1: i32, %arg2: i32) -> (i32, i32, i32) {
    %c0_i32 = arith.constant 0 : i32
    return %arg0, %arg2, %arg1 : i32, i32, i32
  }
}

</mosaic_0001>

<bundles_post_ra>
// kernel: tpu_custom_call.1
= control target key start
LH: loop header
LB: loop body
LE: loop exit
PB: predicated region body
PF: predicated region fallthrough
CT: control target
= control target key end

     0   :  { %8 = vsyncpa [#allocation4], 0  ;;  %s4361_s0 = inlined_call_operand.vmem [shape: f32[2,4,18,18], index: 0, kind: input, shape index: {}]   ;;  %s4362_s1 = inlined_call_operand.vmem [shape: f32[8,36], index: 1, kind: input, shape index: {}]   ;;  %s4363_s2 = inlined_call_operand.vmem [shape: f32[8,1], index: 2, kind: input, shape index: {}]   ;;  %s4364_s3 = inlined_call_operand.hbm [shape: f32[2,8,256], index: 3, kind: output, shape index: {}]  }
   0x1   :  { %10 = vsyncpa [#allocation4 + $0x1], 0  ;;  %s2859_s12 = smov 0   ;;  %s2861_s13 = smov 0  }
   0x2   :  { %s2863_s14 = smov 0   ;;  %s2865_s15 = smov 0  }
   0x3   :  { %s2867_s16 = smov 0   ;;  %s2869_s17 = smov 0  }
   0x4 LB: > { %s2625_s18 = sadd.s32 4294967295, %s2823_s17   ;;  %s2626_s19 = sadd.s32 4294967294, %s2823_s17   ;;  %s2823_s17 = sphi %s2869_s17, %s16_s17   ;;  %s2819_s16 = sphi %s2867_s16, %s4463_s16   ;;  %s2815_s15 = sphi %s2865_s15, %s4462_s15   ;;  %s2811_s14 = sphi %s2863_s14, %s4461_s14   ;;  %s2807_s13 = sphi %s2861_s13, %s4460_s13   ;;  %s2803_s12 = sphi %s2859_s12, %s4459_s12  }
   0x5   : > { %s35_s20 = sadd.s32 1, %s2819_s16  ;;  %s124_s21 = sadd.s32 1, %s2811_s14 }
   0x6   : > { %p37_p0 = scmp.ge.s32.totalorder %s35_s20, 2  ;;  %p134_p1 = scmp.ne.s32.totalorder %s2811_s14, %s2807_s13 }
   0x7   : > { %p135_p2 = scmp.eq.s32.totalorder %s2625_s18, 1  ;;  %p140_p3 = scmp.ne.s32.totalorder %s2807_s13, %s2803_s12 }
   0x8   : > { %s4465_s20 = smov (%p37_p0, %s35_s20), 0  ;;  %p141_p5 = scmp.eq.s32.totalorder %s2626_s19, 1 }
   0x9   : > { %p2899_p4 = por %p135_p2, %p134_p1  ;;  %s117_s23 = ssub.s32 %s2819_s16, %s4465_s20 }
   0xa   : > { %p2631_p6 = scmp.ge.s32.totalorder %s2823_s17, 1  ;;  %p122_p7 = scmp.eq.s32.totalorder %s117_s23, 0 }
   0xb   : > { %p2906_p8 = por %p141_p5, %p140_p3  ;;  %p181_p9 = scmp.lt.s32.totalorder %s2823_s17, 3 }
   0xc   : > { %s2912_s25 = scalar_select %p122_p7, %s2811_s14, %s124_s21  }
   0xd   : > { %p182_p10 = pnand %p2631_p6, %p181_p9 }
   0xf   : > { %185 = sbr.rel (%p182_p10) target bundleno = 752 (0x2f0), region = 32 }
  0x16   : > { %p213_p11 = scmp.lt.s32.totalorder %s2815_s15, 1  ;;  %v244_v0 = vlaneseq  ;;  %v2825_v1 = vmov 1983009808   ;;  %v4365_v3 = vmov 0.0   ;;  %s2827_s4 = smov 127   ;;  %vm431_vm0 = vcmask 130048  }
  0x17   : > { %v242_v2 = vunpack.c.l.s4 %v2825_v1  ;;  %2490 = vmatprep.mubr.f32.mxu0 %v4365_v3  ;;  %s2828_s5 = smov 126   ;;  %v2829_v60 = vmov 1934713408   ;;  %s2830_s6 = smov 16   ;;  %vm433_vm1 = vcmask 261120   ;;  %vm435_vm2 = vcmask 392192  }
  0x18   : > { %s214_s26 = scalar_select %p213_p11, %s2815_s15, 1  ;;  %v2917_v5 = vshrl.u32 %v244_v0, 7  ;;  %v274_v61 = vunpack.c.l.s4 %v2829_v60  ;;  %vm439_vm3 = vcmask 654336   ;;  %vm437_vm4 = vcmask 523264  }
  0x19   : > { %v243_v4 = vunpack.c.0.s8 %v242_v2  ;;  %s2831_s7 = smov 32   ;;  %s2832_s8 = smov 48   ;;  %vm441_vm5 = vcmask 785408   ;;  %vm443_vm6 = vcmask 916480   ;;  %vm2419_vm7 = vcmask 1043456  }
  0x1a   : > { %s2651_s27 = smul.u32 96, %s214_s26  ;;  %v275_v2 = vunpack.c.0.s8 %v274_v61  ;;  %s2833_s9 = smov 64   ;;  %vm2415_vm8 = vcmask 293888  }
  0x1b   : > { %v2934_v11 = vsub.s32 %v243_v4, %v2917_v5  ;;  %s2834_s10 = smov 80   ;;  %s2835_s11 = smov 96  }
  0x1c   : > { %s2922_s30 = scalar_lea.vmem %s4361_s0, %s2651_s27  ;;  %s2836_s18 = smov 112  }
  0x1d   : > { %v459_v6 = vld [vmem:[%s2922_s30 + $0x38] sm:$0xff]  ;;  %v455_v7 = vld [vmem:[%s2922_s30 + $0x8] sm:$0xff]  ;;  %v461_v8 = vld [vmem:[%s2922_s30 + $0x50] sm:$0xff]  ;;  %s210_s27 = sand.u32 1, %s2807_s13   ;;  %s2642_s29 = sshll.u32 %s2815_s15, 8 }
  0x1e   : > { %480 = vrot.lane.b32.xlu1 %v459_v6, %s2827_s4  ;;  %472 = vrot.lane.b32.xlu0 %v455_v7, %s2827_s4  ;;  %v457_v9 = vld [vmem:[%s2922_s30 + $0x20] sm:$0xff]  ;;  %v2931_v10 = vld [vmem:[%s2922_s30 + $0x18] sm:$0xff]  ;;  %v307_v12 = vcombine.low %v455_v7, %v459_v6  ;;  %v308_v38 = vcombine.high %v455_v7, %v459_v6  ;;  %s2632_s28 = sshll.u32 %s210_s27, 4  ;;  %s2838_s15 = smov [#allocation3]  }
  0x1f   : > { %v2937_v13 = vld [vmem:[%s2922_s30] sm:$0xff]  ;;  %v2940_v14 = vld [vmem:[%s2922_s30 + $0x48] sm:$0xff]  ;;  %v2943_v15 = vld [vmem:[%s2922_s30 + $0x30] sm:$0xff]  ;;  %v323_v16 = vcombine.low %v457_v9, %v461_v8  ;;  %v324_v39 = vcombine.high %v457_v9, %v461_v8 }
  0x20   : > { %v2946_v17 = vld [vmem:[%s2922_s30 + $0x21] sm:$0xff]  ;;  %v2949_v18 = vld [vmem:[%s2922_s30 + $0x51] sm:$0xff]  ;;  %v2952_v19 = vrot.slane %v307_v12, %v2934_v11  ;;  %v239_v20 = vcombine.low %v2937_v13, %v2943_v15  ;;  %v255_v21 = vcombine.low %v2931_v10, %v2940_v14  ;;  %v2966_v24 = vld [vmem:[%s2922_s30 + $0x9] sm:$0xff]  ;;  %v3034_v40 = vrot.slane %v308_v38, %v2934_v11 }
  0x21   : > { %v2959_v22 = vrot.slane %v323_v16, %v2934_v11  ;;  %v1049_v23 = vcombine.high %v2946_v17, %v2949_v18  ;;  %v2969_v25 = vld [vmem:[%s2922_s30 + $0x39] sm:$0xff]  ;;  %v3024_v36 = vld [vmem:[%s2922_s30 + $0x22] sm:$0xff]  ;;  %v3027_v37 = vld [vmem:[%s2922_s30 + $0xa] sm:$0xff]  ;;  %v3037_v41 = vrot.slane %v324_v39, %v2934_v11  ;;  %v240_v54 = vcombine.high %v2937_v13, %v2943_v15 }
  0x22   : > { %484 = vrot.lane.b32.xlu1 %v461_v8, %s2827_s4  ;;  %476 = vrot.lane.b32.xlu0 %v457_v9, %s2827_s4  ;;  %v2972_v26 = vrot.slane %v239_v20, %v2934_v11  ;;  %v2975_v27 = vrot.slane %v255_v21, %v2934_v11  ;;  %v1033_v30 = vcombine.high %v2966_v24, %v2969_v25  ;;  %v3040_v42 = vld [vmem:[%s2922_s30 + $0x52] sm:$0xff]  ;;  %v3043_v43 = vld [vmem:[%s2922_s30 + $0x3a] sm:$0xff] }
  0x23   : > { %v339_v28 = vcombine.low %v2952_v19, %v2959_v22  ;;  %v340_v29 = vcombine.high %v2952_v19, %v2959_v22  ;;  %v2986_v32 = vrot.slane %v1049_v23, %v2934_v11  ;;  %v3052_v45 = vld [vmem:[%s2922_s30 + $0x1] sm:$0xff]  ;;  %v3055_v46 = vld [vmem:[%s2922_s30 + $0x19] sm:$0xff]  ;;  %v3062_v47 = vld [vmem:[%s2922_s30 + $0x31] sm:$0xff]  ;;  %v256_v55 = vcombine.high %v2931_v10, %v2940_v14 }
  0x24   : > { %v271_v31 = vcombine.low %v2972_v26, %v2975_v27  ;;  %v2989_v33 = vrot.slane %v1033_v30, %v2934_v11  ;;  %v272_v35 = vcombine.high %v2972_v26, %v2975_v27  ;;  %v3065_v48 = vld [vmem:[%s2922_s30 + $0x49] sm:$0xff]  ;;  %v3075_v50 = vld [vmem:[%s2922_s30 + $0x1a] sm:$0xff]  ;;  %v3084_v52 = vld [vmem:[%s2922_s30 + $0x32] sm:$0xff]  ;;  %v3106_v56 = vrot.slane %v240_v54, %v2934_v11 }
  0x25   : > { %v3072_v49 = vld [vmem:[%s2922_s30 + $0x2] sm:$0xff]  ;;  %v3087_v53 = vld [vmem:[%s2922_s30 + $0x4a] sm:$0xff]  ;;  %v3109_v57 = vrot.slane %v256_v55, %v2934_v11  ;;  %v1048_v59 = vcombine.low %v2946_v17, %v2949_v18  ;;  %v964_v62 = vcombine.low %v3052_v45, %v3062_v47  ;;  %v980_v63 = vcombine.low %v3055_v46, %v3065_v48  ;;  %s212_s30 = scalar_lea.vmem [#allocation3], %s2632_s28 }
  0x26   : > { %474 = vrot.lane.b32.xlu1 %v2931_v10, %s2827_s4  ;;  %470 = vrot.lane.b32.xlu0 %v2937_v13, %s2827_s4  ;;  %v1080_v34 = vcombine.low %v2989_v33, %v2986_v32  ;;  %v1032_v0 = vcombine.low %v2966_v24, %v2969_v25 }
  0x27   : > { %v1056_v1 = vrot.slane %v1048_v59, %v2934_v11  ;;  %v972_v4 = vrot.slane %v964_v62, %v2934_v11 }
  0x2a   : > { %482 = vrot.lane.b32.xlu1 %v2940_v14, %s2827_s4  ;;  %478 = vrot.lane.b32.xlu0 %v2943_v15, %s2827_s4 }
  0x2e   : > { %730 = vrot.lane.b32.xlu1 %v457_v9, %s2828_s5  ;;  %726 = vrot.lane.b32.xlu0 %v455_v7, %s2828_s5  ;;  %v1040_v7 = vrot.slane %v1032_v0, %v2934_v11 }
  0x30   : > { %v1065_v16 = vcombine.high %v1040_v7, %v1056_v1 }
  0x32   : > { %738 = vrot.lane.b32.xlu1 %v461_v8, %s2828_s5  ;;  %734 = vrot.lane.b32.xlu0 %v459_v6, %s2828_s5  ;;  %v988_v6 = vrot.slane %v980_v63, %v2934_v11  ;;  %v3142_v8 = vsub.s32 %v275_v2, %v2917_v5 }
  0x34   : > { %v996_v9 = vcombine.low %v972_v4, %v988_v6  ;;  %v3158_v5 = vrot.slane %v339_v28, %v3142_v8  ;;  %v1079_v20 = vrot.slane %v1065_v16, %v3142_v8  ;;  %v997_v21 = vcombine.high %v972_v4, %v988_v6 }
  0x35   : > { %v3193_v30 = vrot.slane %v340_v29, %v3142_v8  ;;  %v3203_v38 = vrot.slane %v1080_v34, %v3142_v8 }
  0x36   : > { %728 = vrot.lane.b32.xlu1 %v2931_v10, %s2828_s5  ;;  %724 = vrot.lane.b32.xlu0 %v2937_v13, %s2828_s5  ;;  %v1064_v10 = vcombine.low %v1040_v7, %v1056_v1  ;;  %v3149_v12 = vrot.slane %v996_v9, %v3142_v8  ;;  %4395 = vst [vmem:[#allocation8_spill] sm:$0xff] %v3158_v5 }
  0x37   : > { %v1011_v23 = vrot.slane %v997_v21, %v3142_v8  ;;  %v372_v7 = vcombine.high %v3193_v30, %v4365_v3 }
  0x38   : > { %4393 = vst [vmem:[#allocation6_spill] sm:$0xff] %v3149_v12  ;;  %v3152_v13 = vrot.slane %v1064_v10, %v3142_v8 }
  0x3a   : > { %736 = vrot.lane.b32.xlu1 %v2940_v14, %s2828_s5  ;;  %732 = vrot.lane.b32.xlu0 %v2943_v15, %s2828_s5  ;;  %4394 = vst [vmem:[#allocation7_spill] sm:$0xff] %v3152_v13  ;;  %v1028_v14 = vcombine.high %v3149_v12, %v4365_v3  ;;  %v1096_v15 = vcombine.high %v3152_v13, %v4365_v3 }
  0x3e   : > { %1448 = vrot.lane.b32.xlu1 %v2946_v17, %s2828_s5  ;;  %1444 = vrot.lane.b32.xlu0 %v2966_v24, %s2828_s5 }
  0x42   : > { %1456 = vrot.lane.b32.xlu1 %v2949_v18, %s2828_s5  ;;  %1452 = vrot.lane.b32.xlu0 %v2969_v25, %s2828_s5 }
  0x46   : > { %1918 = vrot.lane.b32.xlu1 %v3024_v36, %s2827_s4  ;;  %1914 = vrot.lane.b32.xlu0 %v3027_v37, %s2827_s4 }
  0x4a   : > { %1926 = vrot.lane.b32.xlu1 %v3040_v42, %s2827_s4  ;;  %1922 = vrot.lane.b32.xlu0 %v3043_v43, %s2827_s4 }
  0x4e   : > { %1442 = vrot.lane.b32.xlu0 %v3052_v45, %s2828_s5  ;;  %1446 = vrot.lane.b32.xlu1 %v3055_v46, %s2828_s5 }
  0x52   : > { %1450 = vrot.lane.b32.xlu0 %v3062_v47, %s2828_s5  ;;  %1454 = vrot.lane.b32.xlu1 %v3065_v48, %s2828_s5 }
  0x56   : > { %1912 = vrot.lane.b32.xlu0 %v3072_v49, %s2827_s4  ;;  %1916 = vrot.lane.b32.xlu1 %v3075_v50, %s2827_s4 }
  0x5a   : > { %1920 = vrot.lane.b32.xlu0 %v3084_v52, %s2827_s4  ;;  %1924 = vrot.lane.b32.xlu1 %v3087_v53, %s2827_s4 }
  0x5e   : > { %1196 = vrot.lane.b32.xlu0 %v2966_v24, %s2827_s4  ;;  %1200 = vrot.lane.b32.xlu1 %v2946_v17, %s2827_s4  ;;  %v1097_v24 = vcombine.high %v1079_v20, %v4365_v3 }
  0x62   : > { %1204 = vrot.lane.b32.xlu0 %v2969_v25, %s2827_s4  ;;  %1208 = vrot.lane.b32.xlu1 %v2949_v18, %s2827_s4  ;;  %v371_v18 = vcombine.high %v3158_v5, %v4365_v3  ;;  %v3183_v25 = vrot.slane %v271_v31, %v3142_v8  ;;  %v1029_v31 = vcombine.high %v1011_v23, %v4365_v3  ;;  %v4402_v5 = vmov 0.0  }
  0x64   : > { %4396 = vst [vmem:[#allocation9_spill] sm:$0xff] %v3183_v25  ;;  %v303_v28 = vcombine.high %v3183_v25, %v4365_v3 }
  0x66   : > { %1194 = vrot.lane.b32.xlu0 %v3052_v45, %s2827_s4  ;;  %1198 = vrot.lane.b32.xlu1 %v3055_v46, %s2827_s4 }
  0x6a   : > { %1202 = vrot.lane.b32.xlu0 %v3062_v47, %s2827_s4  ;;  %1206 = vrot.lane.b32.xlu1 %v3065_v48, %s2827_s4  ;;  %s2520_s4 = sshll.u32 %s212_s30, 4  ;;  %s4316_s4 = int_to_ptr.vmem [resolvable:$true] %s2520_s4 }
  0x6e   : > { %2168 = vrot.lane.b32.xlu0 %v3027_v37, %s2828_s5  ;;  %2172 = vrot.lane.b32.xlu1 %v3024_v36, %s2828_s5 }
  0x72   : > { %2176 = vrot.lane.b32.xlu0 %v3043_v43, %s2828_s5  ;;  %2180 = vrot.lane.b32.xlu1 %v3040_v42, %s2828_s5 }
  0x76   : > { %2166 = vrot.lane.b32.xlu0 %v3072_v49, %s2828_s5  ;;  %2170 = vrot.lane.b32.xlu1 %v3075_v50, %s2828_s5 }
  0x7a   : > { %2174 = vrot.lane.b32.xlu0 %v3084_v52, %s2828_s5  ;;  %2178 = vrot.lane.b32.xlu1 %v3087_v53, %s2828_s5 }
  0x7e   : > { %1101 = vrot.lane.b32.xlu0 %v1028_v14, %s2830_s6  ;;  %1129 = vrot.lane.b32.xlu1 %v1096_v15, %s2830_s6 }
  0x82   : > { %404 = vrot.lane.b32.xlu0 %v371_v18, %s2830_s6  ;;  %1133 = vrot.lane.b32.xlu1 %v1079_v20, %s2831_s7 }
  0x86   : > { %1105 = vrot.lane.b32.xlu0 %v1011_v23, %s2831_s7  ;;  %1137 = vrot.lane.b32.xlu1 %v1097_v24, %s2832_s8 }
  0x8a   : > { %376 = vrot.lane.b32.xlu0 %v303_v28, %s2830_s6  ;;  %408 = vrot.lane.b32.xlu1 %v3193_v30, %s2831_s7 }
  0x8e   : > { %1109 = vrot.lane.b32.xlu0 %v1029_v31, %s2832_s8  ;;  %1141 = vrot.lane.b32.xlu1 %v3203_v38, %s2833_s9 }
  0x90   : > { %v481_v19 = vpop.permute.xlu1 %480  ;;  %v473_v22 = vpop.permute.xlu0 %472 }
  0x91   : > { %v562_v29 = vcombine.low %v473_v22, %v481_v19  ;;  %v563_v9 = vcombine.high %v473_v22, %v481_v19 }
  0x93   : > { %v570_v59 = vrot.slane %v562_v29, %v2934_v11  ;;  %v3236_v24 = vrot.slane %v563_v9, %v2934_v11 }
  0x94   : > { %v485_v39 = vpop.permute.xlu1 %484  ;;  %v477_v54 = vpop.permute.xlu0 %476 }
  0x95   : > { %v578_v55 = vcombine.low %v477_v54, %v485_v39  ;;  %v579_v0 = vcombine.high %v477_v54, %v485_v39 }
  0x97   : > { %v586_v60 = vrot.slane %v578_v55, %v2934_v11  ;;  %v3226_v16 = vrot.slane %v579_v0, %v2934_v11 }
  0x98   : > { %v3210_v61 = vpop.permute.xlu1 %474  ;;  %v3212_v34 = vpop.permute.xlu0 %470 }
  0x99   : > { %v594_v62 = vcombine.low %v570_v59, %v586_v60  ;;  %v595_v63 = vcombine.high %v570_v59, %v586_v60  ;;  %v610_v29 = vcombine.low %v3236_v24, %v3226_v16 }
  0x9b   : > { %v609_v1 = vrot.slane %v595_v63, %v3142_v8  ;;  %v3216_v2 = vrot.slane %v594_v62, %v3142_v8  ;;  %v618_v0 = vrot.slane %v610_v29, %v3142_v8 }
  0x9c   : > { %v483_v4 = vpop.permute.xlu1 %482  ;;  %v479_v6 = vpop.permute.xlu0 %478 }
  0x9d   : > { %4397 = vst [vmem:[#allocation10_spill] sm:$0xff] %v3216_v2  ;;  %v510_v10 = vcombine.low %v3210_v61, %v483_v4  ;;  %v494_v14 = vcombine.low %v3212_v34, %v479_v6  ;;  %663 = vrot.lane.b32.xlu1 %v609_v1, %s2831_s7  ;;  %v626_v15 = vcombine.high %v3216_v2, %v4365_v3 }
  0x9f   : > { %v518_v18 = vrot.slane %v510_v10, %v2934_v11  ;;  %v502_v20 = vrot.slane %v494_v14, %v2934_v11  ;;  %659 = vrot.lane.b32.xlu0 %v626_v15, %s2830_s6 }
  0xa0   : > { %v3231_v21 = vpop.permute.xlu1 %730  ;;  %v3233_v23 = vpop.permute.xlu0 %726 }
  0xa1   : > { %v526_v28 = vcombine.low %v502_v20, %v518_v18  ;;  %v527_v31 = vcombine.high %v502_v20, %v518_v18  ;;  %v627_v18 = vcombine.high %v609_v1, %v4365_v3 }
  0xa3   : > { %v541_v19 = vrot.slane %v527_v31, %v3142_v8  ;;  %v3240_v22 = vrot.slane %v526_v28, %v3142_v8 }
  0xa4   : > { %v3244_v39 = vpop.permute.xlu1 %738  ;;  %v3246_v54 = vpop.permute.xlu0 %734 }
  0xa5   : > { %4398 = vst [vmem:[#allocation11_spill] sm:$0xff] %v3240_v22  ;;  %v832_v55 = vcombine.low %v3231_v21, %v3244_v39  ;;  %v816_v59 = vcombine.low %v3233_v23, %v3246_v54  ;;  %635 = vrot.lane.b32.xlu1 %v541_v19, %s2831_s7  ;;  %v558_v60 = vcombine.high %v3240_v22, %v4365_v3 }
  0xa6   : > { %v559_v1 = vcombine.high %v541_v19, %v4365_v3  ;;  %v511_v19 = vcombine.high %v3210_v61, %v483_v4  ;;  %v628_v61 = vcombine.high %v618_v0, %v4365_v3 }
  0xa7   : > { %v840_v62 = vrot.slane %v832_v55, %v2934_v11  ;;  %v824_v63 = vrot.slane %v816_v59, %v2934_v11  ;;  %631 = vrot.lane.b32.xlu0 %v558_v60, %s2830_s6 }
  0xa8   : > { %v3259_v9 = vpop.permute.xlu1 %728  ;;  %v3261_v10 = vpop.permute.xlu0 %724  ;;  %v3303_v58 = vrot.slane %v511_v19, %v2934_v11 }
  0xa9   : > { %v848_v14 = vcombine.low %v824_v63, %v840_v62  ;;  %671 = vrot.lane.b32.xlu1 %v618_v0, %s2833_s9  ;;  %v849_v15 = vcombine.high %v824_v63, %v840_v62 }
  0xab   : > { %v863_v20 = vrot.slane %v849_v15, %v3142_v8  ;;  %v3267_v28 = vrot.slane %v848_v14, %v3142_v8  ;;  %667 = vrot.lane.b32.xlu0 %v627_v18, %s2832_s8 }
  0xac   : > { %v3270_v31 = vpop.permute.xlu1 %736  ;;  %v3272_v29 = vpop.permute.xlu0 %732 }
  0xad   : > { %4399 = vst [vmem:[#allocation12_spill] sm:$0xff] %v3267_v28  ;;  %v764_v55 = vcombine.low %v3259_v9, %v3270_v31  ;;  %v748_v59 = vcombine.low %v3261_v10, %v3272_v29  ;;  %917 = vrot.lane.b32.xlu1 %v863_v20, %s2831_s7  ;;  %v880_v63 = vcombine.high %v3267_v28, %v4365_v3 }
  0xae   : > { %v881_v26 = vcombine.high %v863_v20, %v4365_v3  ;;  %v1098_v20 = vcombine.high %v3203_v38, %v4365_v3  ;;  %v833_v28 = vcombine.high %v3231_v21, %v3244_v39 }
  0xaf   : > { %v772_v60 = vrot.slane %v764_v55, %v2934_v11  ;;  %v756_v62 = vrot.slane %v748_v59, %v2934_v11  ;;  %639 = vrot.lane.b32.xlu0 %v559_v1, %s2832_s8  ;;  %v495_v55 = vcombine.high %v3212_v34, %v479_v6  ;;  %v286_v6 = vrot.slane %v272_v35, %v3142_v8 }
  0xb0   : > { %v3285_v14 = vpop.permute.xlu1 %1448  ;;  %v3287_v15 = vpop.permute.xlu0 %1444 }
  0xb1   : > { %v780_v18 = vcombine.low %v756_v62, %v772_v60  ;;  %913 = vrot.lane.b32.xlu1 %v880_v63, %s2830_s6  ;;  %v3306_v63 = vrot.slane %v495_v55, %v2934_v11 }
  0xb3   : > { %v3295_v59 = vrot.slane %v780_v18, %v3142_v8  ;;  %v981_v18 = vcombine.high %v3055_v46, %v3065_v48  ;;  %v542_v55 = vcombine.low %v3306_v63, %v3303_v58 }
  0xb4   : > { %v3297_v17 = vpop.permute.xlu1 %1456  ;;  %v3299_v1 = vpop.permute.xlu0 %1452 }
  0xb5   : > { %4400 = vst [vmem:[#allocation13_spill] sm:$0xff] %v3295_v59  ;;  %412 = vrot.lane.b32.xlu1 %v372_v7, %s2832_s8  ;;  %v812_v30 = vcombine.high %v3295_v59, %v4365_v3  ;;  %v965_v7 = vcombine.high %v3052_v45, %v3062_v47  ;;  %v1550_v0 = vcombine.low %v3285_v14, %v3297_v17 }
  0xb6   : > { %v1534_v19 = vcombine.low %v3287_v15, %v3299_v1  ;;  %v3341_v46 = vrot.slane %v981_v18, %v2934_v11  ;;  %v781_v18 = vcombine.high %v756_v62, %v772_v60 }
  0xb7   : > { %885 = vrot.lane.b32.xlu0 %v812_v30, %s2830_s6  ;;  %v3338_v45 = vrot.slane %v965_v7, %v2934_v11  ;;  %v3351_v30 = vrot.slane %v1550_v0, %v2934_v11  ;;  %v550_v7 = vrot.slane %v542_v55, %v3142_v8 }
  0xb8   : > { %v3312_v34 = vpop.permute.xlu1 %1918  ;;  %v3314_v4 = vpop.permute.xlu0 %1914  ;;  %v795_v62 = vrot.slane %v781_v18, %v3142_v8 }
  0xb9   : > { %675 = vrot.lane.b32.xlu1 %v628_v61, %s2834_s10  ;;  %v3354_v61 = vrot.slane %v1534_v19, %v2934_v11  ;;  %v1012_v38 = vcombine.low %v3338_v45, %v3341_v46 }
  0xbb   : > { %380 = vrot.lane.b32.xlu0 %v286_v6, %s2831_s7  ;;  %v1566_v60 = vcombine.low %v3354_v61, %v3351_v30 }
  0xbc   : > { %v3333_v27 = vpop.permute.xlu1 %1926  ;;  %v3335_v35 = vpop.permute.xlu0 %1922 }
  0xbd   : > { %v2020_v47 = vcombine.low %v3312_v34, %v3333_v27  ;;  %v2004_v48 = vcombine.low %v3314_v4, %v3335_v35  ;;  %921 = vrot.lane.b32.xlu1 %v881_v26, %s2832_s8 }
  0xbf   : > { %v3358_v51 = vrot.slane %v2020_v47, %v2934_v11  ;;  %v3361_v44 = vrot.slane %v2004_v48, %v2934_v11  ;;  %643 = vrot.lane.b32.xlu0 %v550_v7, %s2833_s9  ;;  %v1020_v47 = vrot.slane %v1012_v38, %v3142_v8  ;;  %v4404_v38 = vcombine.low %v3034_v40, %v3037_v41 }
  0xc0   : > { %v3364_v26 = vpop.permute.xlu0 %1442  ;;  %v3368_v0 = vpop.permute.xlu1 %1446 }
  0xc1   : > { %v2036_v19 = vcombine.low %v3361_v44, %v3358_v51  ;;  %1145 = vrot.lane.b32.xlu1 %v1098_v20, %s2834_s10  ;;  %v817_v20 = vcombine.high %v3233_v23, %v3246_v54  ;;  %v363_v22 = vrot.slane %v4404_v38, %v3142_v8  ;;  %v3405_v23 = vrot.slane %v833_v28, %v2934_v11 }
  0xc2   : > { %v611_v54 = vcombine.high %v3236_v24, %v3226_v16 }
  0xc3   : > { %v3377_v55 = vrot.slane %v2036_v19, %v3142_v8  ;;  %889 = vrot.lane.b32.xlu0 %v795_v62, %s2831_s7  ;;  %v3392_v19 = vrot.slane %v1566_v60, %v3142_v8  ;;  %v3408_v39 = vrot.slane %v817_v20, %v2934_v11 }
  0xc4   : > { %v3381_v48 = vpop.permute.xlu0 %1450  ;;  %v3383_v3 = vpop.permute.xlu1 %1454  ;;  %v625_v28 = vrot.slane %v611_v54, %v3142_v8 }
  0xc5   : > { %4401 = vst [vmem:[#allocation14_spill] sm:$0xff] %v3377_v55  ;;  %v2068_v18 = vcombine.high %v3377_v55, %v4402_v5  ;;  %4403 = vst [vmem:[#allocation15_spill] sm:$0xff] %v3392_v19  ;;  %v1598_v60 = vcombine.high %v3392_v19, %v4402_v5  ;;  %v864_v20 = vcombine.low %v3408_v39, %v3405_v23 }
  0xc6   : > { %v1466_v16 = vcombine.low %v3364_v26, %v3381_v48  ;;  %v1482_v24 = vcombine.low %v3368_v0, %v3383_v3  ;;  %v560_v19 = vcombine.high %v550_v7, %v4402_v5 }
  0xc7   : > { %2101 = vrot.lane.b32.xlu1 %v2068_v18, %s2830_s6  ;;  %1113 = vrot.lane.b32.xlu0 %v1020_v47, %s2833_s9  ;;  %v304_v18 = vcombine.high %v286_v6, %v4402_v5  ;;  %v872_v54 = vrot.slane %v864_v20, %v3142_v8  ;;  %v4409_v20 = vcombine.high %v2989_v33, %v2986_v32 }
  0xc8   : > { %v3400_v12 = vpop.permute.xlu0 %1912  ;;  %v3402_v21 = vpop.permute.xlu1 %1916  ;;  %v3437_v25 = vrot.slane %v1466_v16, %v2934_v11  ;;  %v3440_v13 = vrot.slane %v1482_v24, %v2934_v11  ;;  %v1567_v24 = vcombine.high %v3354_v61, %v3351_v30  ;;  %v813_v32 = vcombine.high %v795_v62, %v4402_v5 }
  0xc9   : > { %4405 = vst [vmem:[#allocation16_spill] sm:$0xff] %v3400_v12  ;;  %4406 = vst [vmem:[#allocation17_spill] sm:$0xff] %v3402_v21  ;;  %v1095_v2 = vrot.slane %v4409_v20, %v3142_v8  ;;  %v1030_v33 = vcombine.high %v1020_v47, %v4402_v5 }
  0xca   : > { %v3475_v61 = vrot.slane %v1567_v24, %v3142_v8 }
  0xcb   : > { %416 = vrot.lane.b32.xlu1 %v363_v22, %s2833_s9  ;;  %1631 = vrot.lane.b32.xlu0 %v1598_v60, %s2830_s6 }
  0xcc   : > { %v3417_v38 = vpop.permute.xlu0 %1920  ;;  %v3419_v59 = vpop.permute.xlu1 %1924 }
  0xcd   : > { %4407 = vst [vmem:[#allocation18_spill] sm:$0xff] %v3417_v38  ;;  %4408 = vst [vmem:[#allocation19_spill] sm:$0xff] %v3419_v59  ;;  %v1936_v55 = vcombine.low %v3400_v12, %v3417_v38  ;;  %v1498_v12 = vcombine.low %v3437_v25, %v3440_v13 }
  0xcf   : > { %679 = vrot.lane.b32.xlu1 %v625_v28, %s2835_s11  ;;  %384 = vrot.lane.b32.xlu0 %v304_v18, %s2832_s8  ;;  %v1952_v18 = vcombine.low %v3402_v21, %v3419_v59  ;;  %v3461_v21 = vrot.slane %v1936_v55, %v2934_v11  ;;  %v2037_v55 = vcombine.high %v3361_v44, %v3358_v51 }
  0xd0   : > { %v3430_v6 = vpop.permute.xlu0 %1196  ;;  %v3432_v60 = vpop.permute.xlu1 %1200  ;;  %v3482_v62 = vrot.slane %v1498_v12, %v3142_v8  ;;  %v373_v12 = vcombine.high %v363_v22, %v4402_v5  ;;  %v1756_v22 = vcombine.low %v3027_v37, %v3043_v43 }
  0xd1   : > { %v3464_v59 = vrot.slane %v1952_v18, %v2934_v11  ;;  %v2051_v24 = vrot.slane %v2037_v55, %v3142_v8  ;;  %v749_v55 = vcombine.high %v3261_v10, %v3272_v29  ;;  %v543_v29 = vcombine.high %v3306_v63, %v3303_v58 }
  0xd2   : > { %4410 = vst [vmem:[#allocation20_spill] sm:$0xff] %v3482_v62  ;;  %v1530_v44 = vcombine.high %v3482_v62, %v4402_v5 }
  0xd3   : > { %925 = vrot.lane.b32.xlu1 %v872_v54, %s2833_s9  ;;  %647 = vrot.lane.b32.xlu0 %v560_v19, %s2834_s10  ;;  %v1968_v18 = vcombine.low %v3461_v21, %v3464_v59 }
  0xd4   : > { %v3452_v7 = vpop.permute.xlu0 %1204  ;;  %v3454_v16 = vpop.permute.xlu1 %1208 }
  0xd5   : > { %v3495_v51 = vrot.slane %v1968_v18, %v3142_v8  ;;  %v1772_v18 = vcombine.low %v3024_v36, %v3040_v42 }
  0xd7   : > { %1149 = vrot.lane.b32.xlu1 %v1095_v2, %s2835_s11  ;;  %893 = vrot.lane.b32.xlu0 %v813_v32, %s2832_s8  ;;  %4411 = vst [vmem:[#allocation21_spill] sm:$0xff] %v3495_v51  ;;  %v2000_v62 = vcombine.high %v3495_v51, %v4402_v5  ;;  %v3529_v51 = vrot.slane %v749_v55, %v2934_v11 }
  0xd8   : > { %v3470_v19 = vpop.permute.xlu0 %1194  ;;  %v3472_v30 = vpop.permute.xlu1 %1198  ;;  %v3540_v58 = vrot.slane %v1772_v18, %v2934_v11  ;;  %v1099_v18 = vcombine.high %v1095_v2, %v4402_v5 }
  0xdb   : > { %1635 = vrot.lane.b32.xlu1 %v3475_v61, %s2831_s7  ;;  %1117 = vrot.lane.b32.xlu0 %v1030_v33, %s2834_s10  ;;  %v765_v33 = vcombine.high %v3259_v9, %v3270_v31  ;;  %v4414_v9 = vcombine.low %v3106_v56, %v3109_v57  ;;  %v629_v31 = vcombine.high %v625_v28, %v4402_v5 }
  0xdc   : > { %v3487_v47 = vpop.permute.xlu0 %1202  ;;  %v3489_v20 = vpop.permute.xlu1 %1206  ;;  %v3537_v28 = vrot.slane %v1756_v22, %v2934_v11 }
  0xdd   : > { %v295_v10 = vrot.slane %v4414_v9, %v3142_v8 }
  0xdf   : > { %2105 = vrot.lane.b32.xlu1 %v2051_v24, %s2831_s7  ;;  %1603 = vrot.lane.b32.xlu0 %v1530_v44, %s2830_s6 }
  0xe0   : > { %v3500_v32 = vpop.permute.xlu1 %2172  ;;  %v3508_v38 = vpop.permute.xlu0 %2168 }
  0xe1   : > { %4412 = vst [vmem:[#allocation22_spill] sm:$0xff] %v3500_v32  ;;  %4413 = vst [vmem:[#allocation23_spill] sm:$0xff] %v3508_v38  ;;  %v1302_v32 = vcombine.low %v3432_v60, %v3454_v16 }
  0xe3   : > { %420 = vrot.lane.b32.xlu1 %v373_v12, %s2834_s10  ;;  %2073 = vrot.lane.b32.xlu0 %v2000_v62, %s2830_s6  ;;  %v3526_v12 = vrot.slane %v765_v33, %v2934_v11  ;;  %v1286_v62 = vcombine.low %v3430_v6, %v3452_v7  ;;  %v882_v33 = vcombine.high %v872_v54, %v4402_v5 }
  0xe4   : > { %v3523_v44 = vpop.permute.xlu1 %2180  ;;  %v3543_v63 = vpop.permute.xlu0 %2176  ;;  %v3550_v9 = vrot.slane %v1302_v32, %v2934_v11  ;;  %v1788_v54 = vcombine.low %v3537_v28, %v3540_v58  ;;  %v1013_v32 = vcombine.high %v3338_v45, %v3341_v46 }
  0xe5   : > { %4415 = vst [vmem:[#allocation24_spill] sm:$0xff] %v3523_v44  ;;  %4416 = vst [vmem:[#allocation25_spill] sm:$0xff] %v3543_v63  ;;  %v3547_v55 = vrot.slane %v1286_v62, %v2934_v11  ;;  %v796_v22 = vcombine.low %v3529_v51, %v3526_v12 }
  0xe6   : > { %v1027_v63 = vrot.slane %v1013_v32, %v3142_v8  ;;  %v2069_v32 = vcombine.high %v2051_v24, %v4402_v5  ;;  %v305_v24 = vcombine.high %v295_v10, %v4402_v5 }
  0xe7   : > { %683 = vrot.lane.b32.xlu1 %v629_v31, %s2836_s18  ;;  %388 = vrot.lane.b32.xlu0 %v295_v10, %s2833_s9  ;;  %v557_v31 = vrot.slane %v543_v29, %v3142_v8  ;;  %v1499_v29 = vcombine.high %v3437_v25, %v3440_v13  ;;  %v1318_v62 = vcombine.low %v3547_v55, %v3550_v9 }
  0xe8   : > { %v3557_v44 = vpop.permute.xlu1 %2170  ;;  %v3568_v38 = vpop.permute.xlu0 %2166  ;;  %v804_v2 = vrot.slane %v796_v22, %v3142_v8  ;;  %v1031_v10 = vcombine.high %v1027_v63, %v4402_v5 }
  0xe9   : > { %v3578_v45 = vrot.slane %v1499_v29, %v3142_v8  ;;  %v3583_v25 = vrot.slane %v1318_v62, %v3142_v8  ;;  %v1969_v29 = vcombine.high %v3461_v21, %v3464_v59  ;;  %v1599_v62 = vcombine.high %v3475_v61, %v4402_v5 }
  0xea   : > { %v1218_v59 = vcombine.low %v3470_v19, %v3487_v47  ;;  %v1234_v21 = vcombine.low %v3472_v30, %v3489_v20 }
  0xeb   : > { %929 = vrot.lane.b32.xlu1 %v882_v33, %s2834_s10  ;;  %651 = vrot.lane.b32.xlu0 %v557_v31, %s2835_s11  ;;  %v3573_v33 = vrot.slane %v1788_v54, %v3142_v8  ;;  %4418 = vst [vmem:[#allocation27_spill] sm:$0xff] %v3583_v25  ;;  %v1983_v61 = vrot.slane %v1969_v29, %v3142_v8 }
  0xec   : > { %v3580_v13 = vpop.permute.xlu1 %2178  ;;  %v3589_v22 = vpop.permute.xlu0 %2174  ;;  %v3635_v29 = vrot.slane %v1234_v21, %v2934_v11  ;;  %v561_v21 = vcombine.high %v557_v31, %v4402_v5 }
  0xed   : > { %4417 = vst [vmem:[#allocation26_spill] sm:$0xff] %v3573_v33  ;;  %v1820_v46 = vcombine.high %v3573_v33, %v4402_v5 }
  0xef   : > { %1153 = vrot.lane.b32.xlu1 %v1099_v18, %s2836_s18  ;;  %897 = vrot.lane.b32.xlu0 %v804_v2, %s2833_s9  ;;  %v1350_v18 = vcombine.high %v3583_v25, %v4402_v5 }
  0xf0   : > { %v3595_v54 = vpop.permute.xlu1 %1129  ;;  %v3603_v33 = vpop.permute.xlu0 %1101 }
  0xf1   : > { %4419 = vst [vmem:[#allocation28_spill] sm:$0xff] %v3603_v33 }
  0xf3   : > { %1607 = vrot.lane.b32.xlu1 %v3578_v45, %s2831_s7  ;;  %1121 = vrot.lane.b32.xlu0 %v1027_v63, %s2835_s11  ;;  %v1319_v63 = vcombine.high %v3547_v55, %v3550_v9  ;;  %v2005_v55 = vcombine.high %v3314_v4, %v3335_v35 }
  0xf5   : > { %v1333_v31 = vrot.slane %v1319_v63, %v3142_v8 }
  0xf7   : > { %1853 = vrot.lane.b32.xlu1 %v1820_v46, %s2830_s6  ;;  %1383 = vrot.lane.b32.xlu0 %v1350_v18, %s2830_s6  ;;  %v4420_v46 = vcombine.high %v3034_v40, %v3037_v41  ;;  %v3613_v18 = vpop.permute.xlu1 %1133  ;;  %v3623_v40 = vpop.permute.xlu0 %404  ;;  %v1551_v41 = vcombine.high %v3285_v14, %v3297_v17  ;;  %v1688_v17 = vcombine.low %v3072_v49, %v3084_v52 }
  0xf8   : > { %4421 = vst [vmem:[#allocation29_spill] sm:$0xff] %v3623_v40  ;;  %v1704_v14 = vcombine.low %v3075_v50, %v3087_v53 }
  0xf9   : > { %v3610_v25 = vrot.slane %v4420_v46, %v3142_v8  ;;  %v3632_v46 = vrot.slane %v1218_v59, %v2934_v11 }
  0xfb   : > { %2109 = vrot.lane.b32.xlu1 %v2069_v32, %s2832_s8  ;;  %1639 = vrot.lane.b32.xlu0 %v1599_v62, %s2832_s8  ;;  %v1535_v32 = vcombine.high %v3287_v15, %v3299_v1  ;;  %v814_v62 = vcombine.high %v804_v2, %v4402_v5  ;;  %v3638_v33 = vpop.permute.xlu1 %1137  ;;  %v3647_v15 = vrot.slane %v1551_v41, %v2934_v11 }
  0xfc   : > { %v865_v2 = vcombine.high %v3408_v39, %v3405_v23  ;;  %v1250_v59 = vcombine.low %v3632_v46, %v3635_v29  ;;  %v3664_v41 = vrot.slane %v1688_v17, %v2934_v11  ;;  %v2021_v39 = vcombine.high %v3312_v34, %v3333_v27 }
  0xfd   : > { %v3650_v1 = vrot.slane %v1535_v32, %v2934_v11  ;;  %v3667_v32 = vrot.slane %v1704_v14, %v2934_v11  ;;  %v1789_v17 = vcombine.high %v3537_v28, %v3540_v58  ;;  %v3694_v27 = vrot.slane %v2005_v55, %v2934_v11 }
  0xfe   : > { %v3691_v4 = vrot.slane %v2021_v39, %v2934_v11 }
  0xff   : > { %424 = vrot.lane.b32.xlu1 %v3610_v25, %s2835_s11  ;;  %2077 = vrot.lane.b32.xlu0 %v1983_v61, %s2831_s7  ;;  %v1582_v23 = vcombine.low %v3650_v1, %v3647_v15  ;;  %v3675_v9 = vpop.permute.xlu1 %408  ;;  %v1720_v34 = vcombine.low %v3664_v41, %v3667_v32  ;;  %v1803_v28 = vrot.slane %v1789_v17, %v3142_v8 }
 0x100   : > { %4422 = vst [vmem:[#allocation30_spill] sm:$0xff] %v3675_v9 }
 0x101   : > { %v1590_v35 = vrot.slane %v1582_v23, %v3142_v8  ;;  %v3705_v58 = vrot.slane %v1720_v34, %v3142_v8  ;;  %v1531_v23 = vcombine.high %v3578_v45, %v4402_v5  ;;  %v374_v45 = vcombine.high %v3610_v25, %v4402_v5 }
 0x102   : > { %v797_v25 = vcombine.high %v3529_v51, %v3526_v12 }
 0x103   : > { %901 = vrot.lane.b32.xlu1 %v814_v62, %s2834_s10  ;;  %392 = vrot.lane.b32.xlu0 %v305_v24, %s2834_s10  ;;  %v3659_v24 = vpop.permute.xlu0 %1105  ;;  %v879_v62 = vrot.slane %v865_v2, %v3142_v8  ;;  %v3699_v2 = vpop.permute.xlu1 %1141  ;;  %4424 = vst [vmem:[#allocation32_spill] sm:$0xff] %v3705_v58  ;;  %v1752_v55 = vcombine.high %v3705_v58, %v4402_v5 }
 0x105   : > { %v883_v40 = vcombine.high %v879_v62, %v4402_v5 }
 0x107   : > { %1125 = vrot.lane.b32.xlu1 %v1031_v10, %s2836_s18  ;;  %655 = vrot.lane.b32.xlu0 %v561_v21, %s2836_s18  ;;  %v3680_v10 = vrot.slane %v1250_v59, %v3142_v8  ;;  %v3685_v14 = vpop.permute.xlu0 %376  ;;  %v2052_v59 = vcombine.low %v3694_v27, %v3691_v4 }
 0x109   : > { %4423 = vst [vmem:[#allocation31_spill] sm:$0xff] %v3680_v10  ;;  %v1282_v63 = vcombine.high %v3680_v10, %v4402_v5  ;;  %v2060_v17 = vrot.slane %v2052_v59, %v3142_v8  ;;  %v4426_v59 = vcombine.high %v3106_v56, %v3109_v57  ;;  %v1351_v56 = vcombine.high %v1333_v31, %v4402_v5 }
 0x10b   : > { %1387 = vrot.lane.b32.xlu1 %v1333_v31, %s2831_s7  ;;  %933 = vrot.lane.b32.xlu0 %v879_v62, %s2835_s11  ;;  %v3709_v21 = vpop.permute.xlu0 %1109  ;;  %v302_v58 = vrot.slane %v4426_v59, %v3142_v8  ;;  %v4428_v31 = vld [vmem:[#allocation16_spill] sm:$0xff]  ;;  %v4430_v59 = vld [vmem:[#allocation17_spill] sm:$0xff] }
 0x10f   : > { %1643 = vrot.lane.b32.xlu1 %v1590_v35, %s2833_s9  ;;  %1355 = vrot.lane.b32.xlu0 %v1282_v63, %s2830_s6  ;;  %v3713_v39 = vpop.permute.xlu1 %663 }
 0x111   : > { %v3720_v34 = vpop.permute.xlu0 %659 }
 0x113   : > { %1857 = vrot.lane.b32.xlu1 %v1803_v28, %s2831_s7  ;;  %1611 = vrot.lane.b32.xlu0 %v1531_v23, %s2832_s8  ;;  %v2001_v23 = vcombine.high %v1983_v61, %v4402_v5  ;;  %v1483_v61 = vcombine.high %v3368_v0, %v3383_v3  ;;  %v811_v3 = vrot.slane %v797_v25, %v3142_v8 }
 0x115   : > { %v3757_v51 = vrot.slane %v1483_v61, %v2934_v11  ;;  %v1821_v61 = vcombine.high %v1803_v28, %v4402_v5 }
 0x117   : > { %v3722_v63 = vpop.permute.xlu1 %635  ;;  %2113 = vrot.lane.b32.xlu1 %v2060_v17, %s2833_s9  ;;  %1825 = vrot.lane.b32.xlu0 %v1752_v55, %s2830_s6  ;;  %v1467_v55 = vcombine.high %v3364_v26, %v3381_v48  ;;  %v1251_v26 = vcombine.high %v3632_v46, %v3635_v29  ;;  %v1600_v48 = vcombine.high %v1590_v35, %v4402_v5 }
 0x118   : > { %4425 = vst [vmem:[#allocation33_spill] sm:$0xff] %v3722_v63  ;;  %v1721_v35 = vcombine.high %v3664_v41, %v3667_v32 }
 0x119   : > { %v3728_v10 = vpop.permute.xlu0 %631  ;;  %v3754_v57 = vrot.slane %v1467_v55, %v2934_v11  ;;  %v1265_v29 = vrot.slane %v1251_v26, %v3142_v8 }
 0x11b   : > { %v3731_v9 = vpop.permute.xlu1 %671  ;;  %428 = vrot.lane.b32.xlu1 %v374_v45, %s2836_s18  ;;  %2081 = vrot.lane.b32.xlu0 %v2001_v23, %s2832_s8  ;;  %v1514_v12 = vcombine.low %v3754_v57, %v3757_v51  ;;  %v4429_v23 = vld [vmem:[#allocation19_spill] sm:$0xff] }
 0x11c   : > { %v1953_v55 = vcombine.high %v4430_v59, %v4429_v23  ;;  %v1773_v59 = vcombine.high %v3024_v36, %v3040_v42  ;;  %v306_v36 = vcombine.high %v302_v58, %v4402_v5  ;;  %v1583_v42 = vcombine.high %v3650_v1, %v3647_v15 }
 0x11d   : > { %v3749_v45 = vpop.permute.xlu0 %667  ;;  %v1522_v28 = vrot.slane %v1514_v12, %v3142_v8  ;;  %v1283_v15 = vcombine.high %v1265_v29, %v4402_v5 }
 0x11e   : > { %v3791_v26 = vrot.slane %v1953_v55, %v2934_v11  ;;  %v815_v55 = vcombine.high %v811_v3, %v4402_v5 }
 0x11f   : > { %v3746_v63 = vpop.permute.xlu1 %917  ;;  %937 = vrot.lane.b32.xlu1 %v883_v40, %s2836_s18  ;;  %396 = vrot.lane.b32.xlu0 %v302_v58, %s2835_s11  ;;  %v4427_v40 = vld [vmem:[#allocation18_spill] sm:$0xff] }
 0x120   : > { %v1937_v62 = vcombine.high %v4428_v31, %v4427_v40  ;;  %v1303_v40 = vcombine.high %v3432_v60, %v3454_v16  ;;  %v2070_v16 = vcombine.high %v2060_v17, %v4402_v5 }
 0x121   : > { %v3773_v46 = vpop.permute.xlu0 %639 }
 0x122   : > { %v3788_v31 = vrot.slane %v1937_v62, %v2934_v11  ;;  %v1757_v62 = vcombine.high %v3027_v37, %v3043_v43  ;;  %v3831_v37 = vrot.slane %v1773_v59, %v2934_v11  ;;  %v2053_v59 = vcombine.high %v3694_v27, %v3691_v4 }
 0x123   : > { %v3762_v0 = vpop.permute.xlu1 %913  ;;  %1391 = vrot.lane.b32.xlu1 %v1351_v56, %s2832_s8  ;;  %905 = vrot.lane.b32.xlu0 %v811_v3, %s2835_s11  ;;  %v1287_v56 = vcombine.high %v3430_v6, %v3452_v7  ;;  %v1735_v6 = vrot.slane %v1721_v35, %v3142_v8  ;;  %v3805_v7 = vrot.slane %v1303_v40, %v2934_v11 }
 0x124   : > { %v1984_v41 = vcombine.low %v3788_v31, %v3791_v26  ;;  %v2067_v4 = vrot.slane %v2053_v59, %v3142_v8 }
 0x125   : > { %v3802_v60 = vrot.slane %v1287_v56, %v2934_v11  ;;  %v3828_v56 = vrot.slane %v1757_v62, %v2934_v11  ;;  %v1597_v62 = vrot.slane %v1583_v42, %v3142_v8 }
 0x126   : > { %v1992_v35 = vrot.slane %v1984_v41, %v3142_v8 }
 0x127   : > { %1647 = vrot.lane.b32.xlu1 %v1600_v48, %s2834_s10  ;;  %v3777_v25 = vpop.permute.xlu1 %412  ;;  %1359 = vrot.lane.b32.xlu0 %v1265_v29, %s2831_s7  ;;  %v1334_v17 = vcombine.low %v3802_v60, %v3805_v7  ;;  %v1532_v29 = vcombine.high %v1522_v28, %v4402_v5 }
 0x129   : > { %v3793_v48 = vpop.permute.xlu0 %885  ;;  %v1342_v3 = vrot.slane %v1334_v17, %v3142_v8 }
 0x12b   : > { %1861 = vrot.lane.b32.xlu1 %v1821_v61, %s2832_s8  ;;  %v3797_v23 = vpop.permute.xlu1 %675  ;;  %1615 = vrot.lane.b32.xlu0 %v1522_v28, %s2833_s9 }
 0x12d   : > { %v3810_v32 = vpop.permute.xlu0 %380 }
 0x12f   : > { %2117 = vrot.lane.b32.xlu1 %v2070_v16, %s2834_s10  ;;  %v3813_v12 = vpop.permute.xlu1 %921  ;;  %1829 = vrot.lane.b32.xlu0 %v1735_v6, %s2831_s7  ;;  %v1804_v16 = vcombine.low %v3828_v56, %v3831_v37 }
 0x130   : > { %4431 = vst [vmem:[#allocation18_spill] sm:$0xff] %v3813_v12 }
 0x131   : > { %v3823_v61 = vpop.permute.xlu0 %643  ;;  %v1812_v1 = vrot.slane %v1804_v16, %v3142_v8  ;;  %v1753_v16 = vcombine.high %v1735_v6, %v4402_v5  ;;  %v1352_v6 = vcombine.high %v1342_v3, %v4402_v5 }
 0x133   : > { %909 = vrot.lane.b32.xlu1 %v815_v55, %s2836_s18  ;;  %2085 = vrot.lane.b32.xlu0 %v1992_v35, %s2833_s9  ;;  %v3837_v43 = vpop.permute.xlu1 %1145  ;;  %v1219_v55 = vcombine.high %v3470_v19, %v3487_v47  ;;  %v1689_v47 = vcombine.high %v3072_v49, %v3084_v52 }
 0x135   : > { %v3840_v40 = vpop.permute.xlu0 %889  ;;  %v3871_v27 = vrot.slane %v1219_v55, %v2934_v11  ;;  %v3895_v49 = vrot.slane %v1689_v47, %v2934_v11 }
 0x137   : > { %1395 = vrot.lane.b32.xlu1 %v1342_v3, %s2833_s9  ;;  %400 = vrot.lane.b32.xlu0 %v306_v36, %s2836_s18  ;;  %v1235_v36 = vcombine.high %v3472_v30, %v3489_v20  ;;  %v1705_v20 = vcombine.high %v3075_v50, %v3087_v53  ;;  %v1601_v53 = vcombine.high %v1597_v62, %v4402_v5 }
 0x138   : > { %v1515_v3 = vcombine.high %v3754_v57, %v3757_v51  ;;  %v4433_v57 = vld [vmem:[#allocation10_spill] sm:$0xff] }
 0x139   : > { %v2102_v41 = vpop.permute.xlu1 %2101  ;;  %v3847_v58 = vpop.permute.xlu0 %1113  ;;  %v3874_v19 = vrot.slane %v1235_v36, %v2934_v11  ;;  %v2002_v36 = vcombine.high %v1992_v35, %v4402_v5  ;;  %v3898_v50 = vrot.slane %v1705_v20, %v2934_v11  ;;  %v693_v51 = vsel %vm431_vm0, %v4433_v57, %v3720_v34  ;;  %v4436_v57 = vld [vmem:[#allocation9_spill] sm:$0xff] }
 0x13b   : > { %1651 = vrot.lane.b32.xlu1 %v1597_v62, %s2835_s11  ;;  %1363 = vrot.lane.b32.xlu0 %v1283_v15, %s2832_s8  ;;  %v1266_v59 = vcombine.low %v3871_v27, %v3874_v19  ;;  %v1736_v47 = vcombine.low %v3895_v49, %v3898_v50  ;;  %v1529_v62 = vrot.slane %v1515_v3, %v3142_v8 }
 0x13c   : > { %v2071_v3 = vcombine.high %v2067_v4, %v4402_v5 }
 0x13d   : > { %v3855_v17 = vpop.permute.xlu1 %416  ;;  %v3861_v42 = vpop.permute.xlu0 %1631  ;;  %v1274_v35 = vrot.slane %v1266_v59, %v3142_v8  ;;  %v1335_v59 = vcombine.high %v3802_v60, %v3805_v7 }
 0x13f   : > { %1865 = vrot.lane.b32.xlu1 %v1812_v1, %s2833_s9  ;;  %1619 = vrot.lane.b32.xlu0 %v1532_v29, %s2834_s10 }
 0x141   : > { %v3867_v15 = vpop.permute.xlu1 %679  ;;  %v3876_v30 = vpop.permute.xlu0 %384 }
 0x143   : > { %2121 = vrot.lane.b32.xlu1 %v2067_v4, %s2835_s11  ;;  %1833 = vrot.lane.b32.xlu0 %v1753_v16, %s2832_s8  ;;  %v1822_v16 = vcombine.high %v1812_v1, %v4402_v5  ;;  %v1744_v1 = vrot.slane %v1736_v47, %v3142_v8  ;;  %v694_v47 = vsel %vm433_vm1, %v693_v51, %v3713_v39 }
 0x144   : > { %v695_v60 = vsel %vm435_vm2, %v694_v47, %v3749_v45  ;;  %v432_v51 = vsel %vm431_vm0, %v4436_v57, %v3685_v14 }
 0x145   : > { %v3884_v28 = vpop.permute.xlu1 %925  ;;  %v3889_v55 = vpop.permute.xlu0 %647  ;;  %v696_v45 = vsel %vm437_vm4, %v695_v60, %v3731_v9  ;;  %v434_v9 = vsel %vm433_vm1, %v432_v51, %v3810_v32  ;;  %v1805_v32 = vcombine.high %v3828_v56, %v3831_v37  ;;  %v1533_v56 = vcombine.high %v1529_v62, %v4402_v5 }
 0x146   : > { %4432 = vst [vmem:[#allocation16_spill] sm:$0xff] %v3884_v28 }
 0x147   : > { %1399 = vrot.lane.b32.xlu1 %v1352_v6, %s2834_s10  ;;  %2089 = vrot.lane.b32.xlu0 %v2002_v36, %s2834_s10  ;;  %v4434_v36 = vld [vmem:[#allocation14_spill] sm:$0xff] }
 0x149   : > { %v3900_v52 = vpop.permute.xlu1 %1149  ;;  %v3905_v29 = vpop.permute.xlu0 %893 }
 0x14b   : > { %1655 = vrot.lane.b32.xlu1 %v1601_v53, %s2836_s18  ;;  %1367 = vrot.lane.b32.xlu0 %v1274_v35, %s2833_s9  ;;  %v2135_v53 = vsel %vm431_vm0, %v4434_v36, %v2102_v41 }
 0x14d   : > { %v3913_v20 = vpop.permute.xlu1 %1635  ;;  %v3915_v6 = vpop.permute.xlu0 %1117 }
 0x14f   : > { %1869 = vrot.lane.b32.xlu1 %v1822_v16, %s2834_s10  ;;  %1623 = vrot.lane.b32.xlu0 %v1529_v62, %s2835_s11  ;;  %v1985_v16 = vcombine.high %v3788_v31, %v3791_v26  ;;  %v1349_v31 = vrot.slane %v1335_v59, %v3142_v8  ;;  %v4435_v26 = vld [vmem:[#allocation7_spill] sm:$0xff]  ;;  %v1819_v62 = vrot.slane %v1805_v32, %v3142_v8  ;;  %v4442_v32 = vld [vmem:[#allocation20_spill] sm:$0xff] }
 0x150   : > { %v1163_v41 = vsel %vm431_vm0, %v4435_v26, %v3595_v54  ;;  %v697_v54 = vsel %vm439_vm3, %v696_v45, %v3797_v23  ;;  %v1284_v23 = vcombine.high %v1274_v35, %v4402_v5  ;;  %v4437_v26 = vld [vmem:[#allocation25_spill] sm:$0xff] }
 0x151   : > { %v2106_v28 = vpop.permute.xlu1 %2105  ;;  %v3934_v34 = vpop.permute.xlu0 %1603  ;;  %v1999_v39 = vrot.slane %v1985_v16, %v3142_v8  ;;  %v1164_v59 = vsel %vm433_vm1, %v1163_v41, %v3613_v18  ;;  %v698_v36 = vsel %vm441_vm5, %v697_v54, %v3867_v15  ;;  %v2190_v15 = vcombine.low %v3568_v38, %v3589_v22  ;;  %v4438_v41 = vld [vmem:[#allocation23_spill] sm:$0xff] }
 0x152   : > { %v3932_v12 = vsel %vm433_vm1, %v2135_v53, %v2106_v28  ;;  %v1754_v28 = vcombine.high %v1744_v1, %v4402_v5  ;;  %v1165_v18 = vsel %vm435_vm2, %v1164_v59, %v3638_v33  ;;  %v2258_v45 = vcombine.low %v4438_v41, %v4437_v26  ;;  %v4439_v33 = vld [vmem:[#allocation24_spill] sm:$0xff]  ;;  %v4441_v59 = vld [vmem:[#allocation13_spill] sm:$0xff] }
 0x153   : > { %2125 = vrot.lane.b32.xlu1 %v2071_v3, %s2836_s18  ;;  %1837 = vrot.lane.b32.xlu0 %v1744_v1, %s2833_s9  ;;  %v436_v1 = vsel %vm435_vm2, %v434_v9, %v3876_v30  ;;  %v2206_v30 = vcombine.low %v3557_v44, %v3580_v13  ;;  %v2003_v60 = vcombine.high %v1999_v39, %v4402_v5 }
 0x154   : > { %v1166_v37 = vsel %vm437_vm4, %v1165_v18, %v3699_v2  ;;  %v1353_v54 = vcombine.high %v1349_v31, %v4402_v5  ;;  %v940_v9 = vsel %vm431_vm0, %v4441_v59, %v3793_v48  ;;  %v2198_v2 = vrot.slane %v2190_v15, %v2934_v11 }
 0x155   : > { %v3942_v7 = vpop.permute.xlu1 %420  ;;  %v3948_v4 = vpop.permute.xlu0 %2073  ;;  %v4014_v48 = vrot.slane %v2258_v45, %v2934_v11  ;;  %v2207_v59 = vcombine.high %v3557_v44, %v3580_v13 }
 0x157   : > { %1403 = vrot.lane.b32.xlu1 %v1349_v31, %s2835_s11  ;;  %2093 = vrot.lane.b32.xlu0 %v1999_v39, %s2835_s11  ;;  %v1267_v39 = vcombine.high %v3871_v27, %v3874_v19  ;;  %v941_v31 = vsel %vm433_vm1, %v940_v9, %v3840_v40  ;;  %v1823_v40 = vcombine.high %v1819_v62, %v4402_v5 }
 0x159   : > { %v684_v53 = vpop.permute.xlu1 %683  ;;  %v389_v3 = vpop.permute.xlu0 %388 }
 0x15a   : > { %v699_v14 = vsel %vm443_vm6, %v698_v36, %v684_v53  ;;  %v3972_v47 = vsel %vm437_vm4, %v436_v1, %v389_v3  ;;  %v1167_v36 = vsel %vm439_vm3, %v1166_v37, %v3837_v43  ;;  %v2214_v53 = vrot.slane %v2206_v30, %v2934_v11 }
 0x15b   : > { %v703_v16 = vrot.slane %v699_v14, 4  ;;  %1841 = vrot.lane.b32.xlu1 %v1754_v28, %s2834_s10  ;;  %1371 = vrot.lane.b32.xlu0 %v1284_v23, %s2834_s10  ;;  %v4440_v28 = vld [vmem:[#allocation22_spill] sm:$0xff]  ;;  %v1168_v27 = vsel %vm441_vm5, %v1167_v36, %v3900_v52  ;;  %v942_v1 = vsel %vm435_vm2, %v941_v31, %v3905_v29  ;;  %v1737_v52 = vcombine.high %v3895_v49, %v3898_v50  ;;  %v4443_v36 = vld [vmem:[#allocation15_spill] sm:$0xff] }
 0x15c   : > { %v2274_v57 = vcombine.low %v4440_v28, %v4439_v33  ;;  %v2222_v18 = vcombine.low %v2198_v2, %v2214_v53  ;;  %v1658_v29 = vsel %vm431_vm0, %v4442_v32, %v3934_v34  ;;  %v1281_v30 = vrot.slane %v1267_v39, %v3142_v8 }
 0x15d   : > { %707 = vst [vmem:[#allocation2 + $0x8] sm:$0xf0] %v703_v16  ;;  %v3984_v35 = vpop.permute.xlu1 %929  ;;  %v3991_v51 = vpop.permute.xlu0 %651  ;;  %v1751_v49 = vrot.slane %v1737_v52, %v3142_v8  ;;  %v2191_v39 = vcombine.high %v3568_v38, %v3589_v22  ;;  %v2223_v9 = vcombine.high %v2198_v2, %v2214_v53  ;;  %v4445_v2 = vld [vmem:[#allocation6_spill] sm:$0xff] }
 0x15e   : > { %v4017_v43 = vrot.slane %v2274_v57, %v2934_v11  ;;  %v1285_v34 = vcombine.high %v1281_v30, %v4402_v5 }
 0x15f   : > { %2097 = vrot.lane.b32.xlu1 %v2003_v60, %s2836_s18  ;;  %1627 = vrot.lane.b32.xlu0 %v1533_v56, %s2836_s18  ;;  %v4046_v56 = vrot.slane %v2222_v18, %v3142_v8  ;;  %v4446_v18 = vld [vmem:[#allocation21_spill] sm:$0xff] }
 0x160   : > { %v2290_v60 = vcombine.low %v4014_v48, %v4017_v43  ;;  %v2291_v52 = vcombine.high %v4014_v48, %v4017_v43  ;;  %v2128_v32 = vsel %vm431_vm0, %v4446_v18, %v3948_v4 }
 0x161   : > { %v1154_v19 = vpop.permute.xlu1 %1153  ;;  %v898_v3 = vpop.permute.xlu0 %897 }
 0x162   : > { %v1169_v14 = vsel %vm443_vm6, %v1168_v27, %v1154_v19  ;;  %v4023_v16 = vsel %vm437_vm4, %v942_v1, %v898_v3  ;;  %v2254_v27 = vcombine.high %v4046_v56, %v4402_v5  ;;  %v2205_v1 = vrot.slane %v2191_v39, %v2934_v11 }
 0x163   : > { %v1173_v23 = vrot.slane %v1169_v14, 4  ;;  %1407 = vrot.lane.b32.xlu1 %v1353_v54, %s2836_s18  ;;  %1873 = vrot.lane.b32.xlu0 %v1819_v62, %s2835_s11  ;;  %v4051_v54 = vrot.slane %v2290_v60, %v3142_v8  ;;  %v1665_v62 = vsel %vm431_vm0, %v4443_v36, %v3861_v42  ;;  %v4444_v42 = vld [vmem:[#allocation28_spill] sm:$0xff]  ;;  %v2221_v14 = vrot.slane %v2207_v59, %v2934_v11 }
 0x164   : > { %v1666_v19 = vsel %vm433_vm1, %v1665_v62, %v3913_v20  ;;  %v1156_v53 = vsel %vm431_vm0, %v4445_v2, %v4444_v42  ;;  %v1755_v20 = vcombine.high %v1751_v49, %v4402_v5 }
 0x165   : > { %1177 = vst [vmem:[#allocation2 + $0x18] sm:$0xf0] %v1173_v23  ;;  %v1608_v15 = vpop.permute.xlu1 %1607  ;;  %v1122_v57 = vpop.permute.xlu0 %1121  ;;  %v2322_v44 = vcombine.high %v4051_v54, %v4402_v5  ;;  %v2237_v23 = vrot.slane %v2223_v9, %v3142_v8 }
 0x166   : > { %v4037_v45 = vsel %vm433_vm1, %v1658_v29, %v1608_v15 }
 0x167   : > { %1877 = vrot.lane.b32.xlu1 %v1823_v40, %s2836_s18  ;;  %1375 = vrot.lane.b32.xlu0 %v1281_v30, %s2835_s11  ;;  %v2275_v40 = vcombine.high %v4440_v28, %v4439_v33  ;;  %v2238_v28 = vcombine.low %v2205_v1, %v2221_v14  ;;  %v2255_v4 = vcombine.high %v2237_v23, %v4402_v5 }
 0x169   : > { %v4042_v50 = vpop.permute.xlu1 %1853  ;;  %v4048_v37 = vpop.permute.xlu0 %1383 }
 0x16b   : > { %1379 = vrot.lane.b32.xlu1 %v1285_v34, %s2836_s18  ;;  %1845 = vrot.lane.b32.xlu0 %v1751_v49, %s2835_s11  ;;  %v2305_v34 = vrot.slane %v2291_v52, %v3142_v8  ;;  %v4450_v52 = vld [vmem:[#allocation26_spill] sm:$0xff] }
 0x16c   : > { %v1887_v18 = vsel %vm431_vm0, %v4450_v52, %v4042_v50  ;;  %v4453_v50 = vld [vmem:[#allocation30_spill] sm:$0xff] }
 0x16d   : > { %v2110_v31 = vpop.permute.xlu1 %2109  ;;  %v1640_v22 = vpop.permute.xlu0 %1639 }
 0x16e   : > { %v4068_v38 = vsel %vm435_vm2, %v3932_v12, %v2110_v31  ;;  %v4073_v13 = vsel %vm435_vm2, %v1666_v19, %v1640_v22  ;;  %v2259_v12 = vcombine.high %v4438_v41, %v4437_v26  ;;  %v1157_v26 = vsel %vm433_vm1, %v1156_v53, %v3659_v24  ;;  %v4447_v41 = vld [vmem:[#allocation11_spill] sm:$0xff] }
 0x16f   : > { %2327 = vrot.lane.b32.xlu1 %v2254_v27, %s2830_s6  ;;  %2355 = vrot.lane.b32.xlu0 %v2322_v44, %s2830_s6  ;;  %v686_v15 = vsel %vm431_vm0, %v4447_v41, %v3728_v10  ;;  %v2289_v24 = vrot.slane %v2275_v40, %v2934_v11  ;;  %v1158_v43 = vsel %vm435_vm2, %v1157_v26, %v3709_v21  ;;  %v4448_v10 = vld [vmem:[#allocation33_spill] sm:$0xff]  ;;  %v4449_v44 = vld [vmem:[#allocation27_spill] sm:$0xff]  ;;  %v4452_v41 = vld [vmem:[#allocation8_spill] sm:$0xff] }
 0x170   : > { %v2273_v33 = vrot.slane %v2259_v12, %v2934_v11  ;;  %v687_v60 = vsel %vm433_vm1, %v686_v15, %v4448_v10  ;;  %v1159_v59 = vsel %vm437_vm4, %v1158_v43, %v3847_v58  ;;  %v2323_v19 = vcombine.high %v2305_v34, %v4402_v5  ;;  %v4451_v26 = vld [vmem:[#allocation29_spill] sm:$0xff] }
 0x171   : > { %v4085_v3 = vpop.permute.xlu1 %424  ;;  %v2078_v29 = vpop.permute.xlu0 %2077  ;;  %v688_v39 = vsel %vm435_vm2, %v687_v60, %v3773_v46  ;;  %v1160_v21 = vsel %vm439_vm3, %v1159_v59, %v3915_v6  ;;  %v2246_v46 = vrot.slane %v2238_v28, %v3142_v8  ;;  %v1417_v42 = vsel %vm431_vm0, %v4449_v44, %v4048_v37  ;;  %v4454_v60 = vld [vmem:[#allocation12_spill] sm:$0xff] }
 0x172   : > { %v4101_v30 = vsel %vm433_vm1, %v2128_v32, %v2078_v29  ;;  %v689_v11 = vsel %vm437_vm4, %v688_v39, %v3823_v61  ;;  %v1161_v36 = vsel %vm441_vm5, %v1160_v21, %v1122_v57  ;;  %v2306_v31 = vcombine.low %v2273_v33, %v2289_v24 }
 0x173   : > { %2331 = vrot.lane.b32.xlu1 %v2237_v23, %s2831_s7  ;;  %1849 = vrot.lane.b32.xlu0 %v1755_v20, %s2836_s18  ;;  %v690_v9 = vsel %vm439_vm3, %v689_v11, %v3889_v55  ;;  %v2239_v57 = vcombine.high %v2205_v1, %v2221_v14  ;;  %v2256_v2 = vcombine.high %v2246_v46, %v4402_v5  ;;  %v2837_v11 = vmov 0  }
 0x174   : > { %v691_v58 = vsel %vm441_vm5, %v690_v9, %v3991_v51  ;;  %v2314_v12 = vrot.slane %v2306_v31, %v3142_v8  ;;  %v2307_v37 = vcombine.high %v2273_v33, %v2289_v24  ;;  %v445_v15 = vsel %vm431_vm0, %v4452_v41, %v4451_v26  ;;  %2720 = vset.pattern.permute.xlu0 %v2837_v11 }
 0x175   : > { %v4106_v48 = vpop.permute.xlu1 %901  ;;  %v4114_v49 = vpop.permute.xlu0 %392  ;;  %v2253_v14 = vrot.slane %v2239_v57, %v3142_v8  ;;  %v446_v43 = vsel %vm433_vm1, %v445_v15, %v4453_v50 }
 0x176   : > { %v2324_v40 = vcombine.high %v2314_v12, %v4402_v5 }
 0x177   : > { %2335 = vrot.lane.b32.xlu1 %v2255_v4, %s2832_s8  ;;  %2359 = vrot.lane.b32.xlu0 %v2305_v34, %s2831_s7  ;;  %v2257_v29 = vcombine.high %v2253_v14, %v4402_v5  ;;  %v2321_v4 = vrot.slane %v2307_v37, %v3142_v8  ;;  %v947_v34 = vsel %vm431_vm0, %v4454_v60, %v3762_v0  ;;  %s4314_s7 = scalar_lea.hbm %s4364_s3, %s2642_s29 }
 0x178   : > { %v447_v8 = vsel %vm435_vm2, %v446_v43, %v3777_v25  ;;  %v948_v0 = vsel %vm433_vm1, %v947_v34, %v3746_v63 }
 0x179   : > { %v1126_v62 = vpop.permute.xlu1 %1125  ;;  %v656_v61 = vpop.permute.xlu0 %655  ;;  %v448_v59 = vsel %vm437_vm4, %v447_v8, %v3855_v17 }
 0x17a   : > { %v1162_v27 = vsel %vm443_vm6, %v1161_v36, %v1126_v62  ;;  %v692_v22 = vsel %vm443_vm6, %v691_v58, %v656_v61  ;;  %v449_v21 = vsel %vm439_vm3, %v448_v59, %v3942_v7  ;;  %v4455_v36 = vld [vmem:[#allocation18_spill] sm:$0xff]  ;;  %v4456_v7 = vld [vmem:[#allocation16_spill] sm:$0xff] }
 0x17b   : > { %v1172_v6 = vrot.slane %v1162_v27, 4  ;;  %2339 = vrot.lane.b32.xlu1 %v2246_v46, %s2833_s9  ;;  %v702_v55 = vrot.slane %v692_v22, 4  ;;  %2363 = vrot.lane.b32.xlu0 %v2323_v19, %s2832_s8  ;;  %v450_v25 = vsel %vm441_vm5, %v449_v21, %v4085_v3  ;;  %v949_v17 = vsel %vm435_vm2, %v948_v0, %v4455_v36  ;;  %s2502_s8 = scalar_lea.sflag [#allocation4], %s210_s27 }
 0x17c   : > { %v950_v31 = vsel %vm437_vm4, %v949_v17, %v4456_v7 }
 0x17d   : > { %1176 = vst [vmem:[#allocation2 + $0x10] sm:$0xf0] %v1172_v6  ;;  %v1388_v51 = vpop.permute.xlu1 %1387  ;;  %706 = vst [vmem:[#allocation2] sm:$0xf0] %v702_v55  ;;  %v934_v20 = vpop.permute.xlu0 %933  ;;  %v951_v63 = vsel %vm439_vm3, %v950_v31, %v3984_v35 }
 0x17e   : > { %v4143_v53 = vsel %vm433_vm1, %v1417_v42, %v1388_v51  ;;  %v952_v3 = vsel %vm441_vm5, %v951_v63, %v934_v20 }
 0x17f   : > { %2343 = vrot.lane.b32.xlu1 %v2256_v2, %s2834_s10  ;;  %2367 = vrot.lane.b32.xlu0 %v2314_v12, %s2833_s9  ;;  %v944_v12 = vsel %vm439_vm3, %v4023_v16, %v4106_v48  ;;  %s2745_s9 = scalar_lea.vmem %s4316_s4, 256 }
 0x180   : > { %p2746_p12 = scmp.ne.s32.totalorder %s4316_s4, %s2745_s9 }
 0x181   : > { %v4148_v1 = vpop.permute.xlu1 %1643  ;;  %v4151_v23 = vpop.permute.xlu0 %1355 }
 0x182   : > { %v1668_v8 = vsel %vm437_vm4, %v4073_v13, %v4148_v1  ;;  %p2747_p13 = pnand %p2746_p12, %p2899_p4 }
 0x183   : > { %2347 = vrot.lane.b32.xlu1 %v2253_v14, %s2835_s11  ;;  %2371 = vrot.lane.b32.xlu0 %v2324_v40, %s2834_s10  ;;  %s2749_s10 = sshll.u32 %s2838_s15, 4  ;;  %s2750_s10 = int_to_ptr.vmem [resolvable:$false] %s2749_s10 }
 0x184   : > { %p2748_p0 = pneg %p2747_p13  ;;  %p2752_p1 = scmp.lt.s32.totalorder %s4316_s4, %s2750_s10 }
 0x185   : > { %v1858_v32 = vpop.permute.xlu1 %1857  ;;  %v1612_v28 = vpop.permute.xlu0 %1611 }
 0x186   : > { %v4164_v33 = vsel %vm433_vm1, %v1887_v18, %v1858_v32  ;;  %v4169_v24 = vsel %vm435_vm2, %v4037_v45, %v1612_v28  ;;  %v2325_v45 = vcombine.high %v2321_v4, %v4402_v5  ;;  %v2409_v5 = vld [vmem:[%s4363_s2] sm:$0xff]  ;;  %v440_v18 = vsel %vm439_vm3, %v3972_v47, %v4114_v49 }
 0x187   : > { %2351 = vrot.lane.b32.xlu1 %v2257_v29, %s2836_s18  ;;  %2375 = vrot.lane.b32.xlu0 %v2321_v4, %s2835_s11  ;;  %s2751_s11 = scalar_lea.vmem %s2750_s10, 512 }
 0x188   : > { %p2753_p2 = scmp.lt.s32.totalorder %s2751_s11, %s2745_s9 }
 0x189   : > { %v4175_v10 = vpop.permute.xlu1 %2113  ;;  %v4182_v39 = vpop.permute.xlu0 %1825 }
 0x18a   : > { %v2138_v36 = vsel %vm437_vm4, %v4068_v38, %v4175_v10  ;;  %p2754_p3 = por %p2753_p2, %p2752_p1 }
 0x18b   : > { %2379 = vrot.lane.b32.xlu0 %v2325_v45, %s2836_s18 }
 0x18c   : > { %p2755_p5 = pnand %p2754_p3, %p2748_p0 }
 0x18d   : > { %v429_v9 = vpop.permute.xlu1 %428  ;;  %v4200_v46 = vpop.permute.xlu0 %2081 }
 0x18e   : > { %v451_v62 = vsel %vm443_vm6, %v450_v25, %v429_v9 }
 0x18f   : > { %453 = vst [vmem:[#allocation2 + $0x8] sm:$0xf] %v451_v62  ;;  %2412 = vperm.xlu0 %2720, %v2409_v5  }
 0x191   : > { %v938_v58 = vpop.permute.xlu1 %937  ;;  %v397_v61 = vpop.permute.xlu0 %396 }
 0x192   : > { %v953_v27 = vsel %vm443_vm6, %v952_v3, %v938_v58  ;;  %v442_v29 = vsel %vm441_vm5, %v440_v18, %v397_v61 }
 0x193   : > { %955 = vst [vmem:[#allocation2 + $0x18] sm:$0xf] %v953_v27  ;;  %v2130_v27 = vsel %vm435_vm2, %v4101_v30, %v4200_v46 }
 0x195   : > { %v4208_v19 = vpop.permute.xlu1 %1391  ;;  %v906_v6 = vpop.permute.xlu0 %905 }
 0x196   : > { %v2400_v57 = vld [vmem:[#allocation2 + $0x8] sm:$0xff]  ;;  %v945_v14 = vsel %vm441_vm5, %v944_v12, %v906_v6 }
 0x199   : > { %v1648_v22 = vpop.permute.xlu1 %1647  ;;  %v4210_v55 = vpop.permute.xlu0 %1359 }
 0x19a   : > { %v2402_v44 = vld [vmem:[#allocation2 + $0x18] sm:$0xff]  ;;  %v1669_v45 = vsel %vm439_vm3, %v1668_v8, %v1648_v22 }
 0x19b   : > { %v2643_v42 = vpack.c.bf16 %v2402_v44, %v2400_v57 }
 0x19d   : > { %v4212_v51 = vpop.permute.xlu1 %1861  ;;  %2644 = vmatprep.subr.bf16.mxu0 %v2643_v42  ;;  %v1616_v35 = vpop.permute.xlu0 %1615  ;;  %v1419_v42 = vsel %vm435_vm2, %v4143_v53, %v4208_v19 }
 0x19e   : > { %v1661_v10 = vsel %vm437_vm4, %v4169_v24, %v1616_v35  ;;  %v1889_v53 = vsel %vm435_vm2, %v4164_v33, %v4212_v51 }
 0x1a1   : > { %v2118_v2 = vpop.permute.xlu1 %2117  ;;  %v4214_v20 = vpop.permute.xlu0 %1829 }
 0x1a2   : > { %v2139_v17 = vsel %vm439_vm3, %v2138_v36, %v2118_v2 }
 0x1a5   : > { %v910_v37 = vpop.permute.xlu1 %909  ;;  %v2086_v52 = vpop.permute.xlu0 %2085 }
 0x1a6   : > { %v946_v40 = vsel %vm443_vm6, %v945_v14, %v910_v37  ;;  %v2131_v38 = vsel %vm437_vm4, %v2130_v27, %v2086_v52 }
 0x1a7   : > { %954 = vst [vmem:[#allocation2 + $0x10] sm:$0xf] %v946_v40 }
 0x1a9   : > { %v1396_v32 = vpop.permute.xlu1 %1395  ;;  %v401_v26 = vpop.permute.xlu0 %400 }
 0x1aa   : > { %v444_v41 = vsel %vm443_vm6, %v442_v29, %v401_v26  ;;  %v1420_v12 = vsel %vm437_vm4, %v1419_v42, %v1396_v32  ;;  %v4457_v29 = vld [vmem:[#allocation31_spill] sm:$0xff] }
 0x1ab   : > { %452 = vst [vmem:[#allocation2] sm:$0xf] %v444_v41  ;;  %v1410_v26 = vsel %vm431_vm0, %v4457_v29, %v4151_v23 }
 0x1ad   : > { %v1652_v15 = vpop.permute.xlu1 %1651  ;;  %v4226_v16 = vpop.permute.xlu0 %1363 }
 0x1ae   : > { %v2401_v50 = vld [vmem:[#allocation2 + $0x10] sm:$0xff]  ;;  %v1670_v59 = vsel %vm441_vm5, %v1669_v45, %v1652_v15  ;;  %v1411_v15 = vsel %vm433_vm1, %v1410_v26, %v4210_v55 }
 0x1af   : > { %v1412_v33 = vsel %vm435_vm2, %v1411_v15, %v4226_v16 }
 0x1b1   : > { %v1866_v48 = vpop.permute.xlu1 %1865  ;;  %v1620_v28 = vpop.permute.xlu0 %1619 }
 0x1b2   : > { %v2399_v4 = vld [vmem:[#allocation2] sm:$0xff]  ;;  %v1662_v22 = vsel %vm439_vm3, %v1661_v10, %v1620_v28  ;;  %v1890_v32 = vsel %vm437_vm4, %v1889_v53, %v1866_v48 }
 0x1b3   : > { %v2645_v43 = vpack.c.bf16 %v2401_v50, %v2399_v4 }
 0x1b5   : > { %v2122_v60 = vpop.permute.xlu1 %2121  ;;  %2646 = vmatpush1.bf16.msra.mxu0 %v2645_v43  ;;  %v4228_v34 = vpop.permute.xlu0 %1833 }
 0x1b6   : > { %v2140_v13 = vsel %vm441_vm5, %v2139_v17, %v2122_v60 }
 0x1b9   : > { %v1400_v47 = vpop.permute.xlu1 %1399  ;;  %v2090_v49 = vpop.permute.xlu0 %2089 }
 0x1ba   : > { %v2132_v6 = vsel %vm439_vm3, %v2131_v38, %v2090_v49  ;;  %v1421_v35 = vsel %vm439_vm3, %v1420_v12, %v1400_v47  ;;  %v4458_v49 = vld [vmem:[#allocation32_spill] sm:$0xff] }
 0x1bb   : > { %v1880_v8 = vsel %vm431_vm0, %v4458_v49, %v4182_v39 }
 0x1bc   : > { %v1881_v45 = vsel %vm433_vm1, %v1880_v8, %v4214_v20 }
 0x1bd   : > { %v1656_v11 = vpop.permute.xlu1 %1655  ;;  %v1368_v0 = vpop.permute.xlu0 %1367 }
 0x1be   : > { %v1671_v21 = vsel %vm443_vm6, %v1670_v59, %v1656_v11  ;;  %v1413_v48 = vsel %vm437_vm4, %v1412_v33, %v1368_v0  ;;  %v1882_v0 = vsel %vm435_vm2, %v1881_v45, %v4228_v34 }
 0x1bf   : > { %v1675_v25 = vrot.slane %v1671_v21, 4 }
 0x1c1   : > { %1679 = vst [vmem:[#allocation2 + $0x28] sm:$0xf0] %v1675_v25  ;;  %v1870_v9 = vpop.permute.xlu1 %1869  ;;  %v1624_v5 = vpop.permute.xlu0 %1623 }
 0x1c2   : > { %v1663_v2 = vsel %vm441_vm5, %v1662_v22, %v1624_v5  ;;  %v1891_v41 = vsel %vm439_vm3, %v1890_v32, %v1870_v9 }
 0x1c5   : > { %v2126_v1 = vpop.permute.xlu1 %2125  ;;  %v1838_v7 = vpop.permute.xlu0 %1837 }
 0x1c6   : > { %v2141_v62 = vsel %vm443_vm6, %v2140_v13, %v2126_v1  ;;  %v1883_v9 = vsel %vm437_vm4, %v1882_v0, %v1838_v7 }
 0x1c7   : > { %v2145_v31 = vrot.slane %v2141_v62, 4 }
 0x1c9   : > { %2149 = vst [vmem:[#allocation2 + $0x38] sm:$0xf0] %v2145_v31  ;;  %v1404_v63 = vpop.permute.xlu1 %1403  ;;  %v2094_v3 = vpop.permute.xlu0 %2093 }
 0x1ca   : > { %v2133_v57 = vsel %vm441_vm5, %v2132_v6, %v2094_v3  ;;  %v1422_v40 = vsel %vm441_vm5, %v1421_v35, %v1404_v63 }
 0x1cd   : > { %v1842_v58 = vpop.permute.xlu1 %1841  ;;  %v1372_v61 = vpop.permute.xlu0 %1371 }
 0x1ce   : > { %v1414_v43 = vsel %vm439_vm3, %v1413_v48, %v1372_v61  ;;  %v1884_v5 = vsel %vm439_vm3, %v1883_v9, %v1842_v58 }
 0x1d1   : > { %v2098_v44 = vpop.permute.xlu1 %2097  ;;  %v1628_v46 = vpop.permute.xlu0 %1627 }
 0x1d2   : > { %v2134_v30 = vsel %vm443_vm6, %v2133_v57, %v2098_v44  ;;  %v1664_v24 = vsel %vm443_vm6, %v1663_v2, %v1628_v46 }
 0x1d3   : > { %v2144_v14 = vrot.slane %v2134_v30, 4  ;;  %v1674_v37 = vrot.slane %v1664_v24, 4 }
 0x1d5   : > { %2148 = vst [vmem:[#allocation2 + $0x30] sm:$0xf0] %v2144_v14  ;;  %v1408_v52 = vpop.permute.xlu1 %1407  ;;  %1678 = vst [vmem:[#allocation2 + $0x20] sm:$0xf0] %v1674_v37  ;;  %v1874_v18 = vpop.permute.xlu0 %1873 }
 0x1d6   : > { %v1423_v19 = vsel %vm443_vm6, %v1422_v40, %v1408_v52  ;;  %v1892_v28 = vsel %vm441_vm5, %v1891_v41, %v1874_v18  ;;  %v2398_v52 = vld [vmem:[%s4362_s1] sm:$0xff] }
 0x1d7   : > { %1425 = vst [vmem:[#allocation2 + $0x28] sm:$0xf] %v1423_v19 }
 0x1d9   : > { %v1878_v4 = vpop.permute.xlu1 %1877  ;;  %v1376_v50 = vpop.permute.xlu0 %1375 }
 0x1da   : > { %v1893_v51 = vsel %vm443_vm6, %v1892_v28, %v1878_v4  ;;  %v1415_v23 = vsel %vm441_vm5, %v1414_v43, %v1376_v50 }
 0x1db   : > { %1895 = vst [vmem:[#allocation2 + $0x38] sm:$0xf] %v1893_v51 }
 0x1dd   : > { %v1380_v60 = vpop.permute.xlu1 %1379  ;;  %v1846_v55 = vpop.permute.xlu0 %1845 }
 0x1de   : > { %v1416_v47 = vsel %vm443_vm6, %v1415_v23, %v1380_v60  ;;  %v2404_v11 = vld [vmem:[#allocation2 + $0x28] sm:$0xff]  ;;  %v1885_v17 = vsel %vm441_vm5, %v1884_v5, %v1846_v55 }
 0x1df   : > { %1424 = vst [vmem:[#allocation2 + $0x20] sm:$0xf] %v1416_v47 }
 0x1e1   : > { %v2328_v16 = vpop.permute.xlu1 %2327  ;;  %v2356_v59 = vpop.permute.xlu0 %2355 }
 0x1e2   : > { %v2406_v21 = vld [vmem:[#allocation2 + $0x38] sm:$0xff]  ;;  %v2382_v58 = vsel %vm431_vm0, %v4046_v56, %v2328_v16  ;;  %v2389_v44 = vsel %vm431_vm0, %v4051_v54, %v2356_v59 }
 0x1e3   : > { %v2647_v25 = vpack.c.bf16 %v2406_v21, %v2404_v11 }
 0x1e5   : > { %v2332_v36 = vpop.permute.xlu1 %2331  ;;  %2648 = vmatprep.subr.bf16.mxu0 %v2647_v25  ;;  %v1850_v39 = vpop.permute.xlu0 %1849 }
 0x1e6   : > { %v1886_v13 = vsel %vm443_vm6, %v1885_v17, %v1850_v39  ;;  %v2403_v63 = vld [vmem:[#allocation2 + $0x20] sm:$0xff]  ;;  %v2383_v61 = vsel %vm433_vm1, %v2382_v58, %v2332_v36 }
 0x1e7   : > { %1894 = vst [vmem:[#allocation2 + $0x30] sm:$0xf] %v1886_v13 }
 0x1e9   : > { %v2336_v20 = vpop.permute.xlu1 %2335  ;;  %v2360_v1 = vpop.permute.xlu0 %2359 }
 0x1ea   : > { %v2384_v10 = vsel %vm435_vm2, %v2383_v61, %v2336_v20  ;;  %v2390_v30 = vsel %vm433_vm1, %v2389_v44, %v2360_v1 }
 0x1ed   : > { %v2340_v62 = vpop.permute.xlu1 %2339  ;;  %v2364_v31 = vpop.permute.xlu0 %2363 }
 0x1ee   : > { %v2405_v3 = vld [vmem:[#allocation2 + $0x30] sm:$0xff]  ;;  %v2385_v22 = vsel %vm437_vm4, %v2384_v10, %v2340_v62  ;;  %v2391_v12 = vsel %vm435_vm2, %v2390_v30, %v2364_v31 }
 0x1ef   : > { %v2649_v34 = vpack.c.bf16 %v2405_v3, %v2403_v63 }
 0x1f1   : > { %v2344_v27 = vpop.permute.xlu1 %2343  ;;  %2650 = vmatpush1.bf16.msra.mxu0 %v2649_v34  ;;  %v2368_v7 = vpop.permute.xlu0 %2367 }
 0x1f2   : > { %v2386_v57 = vsel %vm439_vm3, %v2385_v22, %v2344_v27  ;;  %v2392_v14 = vsel %vm437_vm4, %v2391_v12, %v2368_v7 }
 0x1f5   : > { %v2348_v38 = vpop.permute.xlu1 %2347  ;;  %v2372_v6 = vpop.permute.xlu0 %2371 }
 0x1f6   : > { %v2387_v42 = vsel %vm441_vm5, %v2386_v57, %v2348_v38  ;;  %v2393_v24 = vsel %vm439_vm3, %v2392_v14, %v2372_v6 }
 0x1f9   : > { %v2352_v2 = vpop.permute.xlu1 %2351  ;;  %v2376_v46 = vpop.permute.xlu0 %2375 }
 0x1fa   : > { %v2388_v56 = vsel %vm443_vm6, %v2387_v42, %v2352_v2  ;;  %v2394_v35 = vsel %vm441_vm5, %v2393_v24, %v2376_v46 }
 0x1fb   : > { %2396 = vst [vmem:[#allocation2 + $0x40] sm:$0xf] %v2388_v56 }
 0x1fd   : > { %v2380_v37 = vpop.permute.xlu0 %2379 }
 0x1fe   : > { %v2395_v54 = vsel %vm443_vm6, %v2394_v35, %v2380_v37 }
 0x1ff   : > { %2397 = vst [vmem:[#allocation2 + $0x48] sm:$0xf] %v2395_v54 }
 0x202   : > { %v2407_v53 = vld [vmem:[#allocation2 + $0x40] sm:$0xf] }
 0x206   : > { %v2408_v40 = vld [vmem:[#allocation2 + $0x48] sm:$0xf] }
 0x207   : > { %2634 = vmatprep.subr.msk.mxu0 %vm2419_vm7, %v2408_v40 }
 0x208   : > { %2635 = vmatpush1.msk.msra.mxu0 %vm2419_vm7, %v2407_v53 }
 0x209   : > { %2636 = vmatmul.mubr.msk.f32.vlgmr.msra.gmra.mrb[0].mxu0 %vm2415_vm8, %v2398_v52 }
 0x20e   : > { %v2413_v19 = vpop.permute.xlu0 %2412 }
 0x2dc   : > { %v2492_v18 = vpop.f32.mrb[0].mxu0 }
 0x2dd   : > { %v2493_v32 = vadd.f32 %v2492_v18, %v2413_v19  ;;  %v2494_v29 = vpop.f32.mrb[1].mxu0 }
 0x2de   : > { %v2495_v26 = vadd.f32 %v2494_v29, %v2413_v19 }
 0x2df   : > { %v2497_v41 = vmax.f32 %v2493_v32, 0.0 }
 0x2e0   : > { %v2498_v15 = vmax.f32 %v2495_v26, 0.0 }
 0x2e1   : > { %2499 = vst [vmem:[%s212_s30] sm:$0xff] %v2497_v41 }
 0x2e2   : > { %2500 = vst [vmem:[%s212_s30 + $0x8] sm:$0xff] %v2498_v15 }
 0x2e3   : > { %2758 = shalt.err (!%p2755_p5)
}
 0x2e4   : > { %s2759_s18 = scalar_lea.hbm %s4314_s7, 256  ;;  %s2763_s23 = scalar_lea.hbm %s4364_s3, 512 }
 0x2e5   : > { %p2760_p6 = scmp.ne.s32.totalorder %s4314_s7, %s2759_s18  ;;  %p2764_p10 = scmp.lt.u32.totalorder %s4314_s7, %s4364_s3 }
 0x2e6   : > { %p2765_p11 = scmp.lt.u32.totalorder %s2763_s23, %s2759_s18  ;;  %p2767_p13 = scmp.lt.u32.totalorder %s2759_s18, %s4314_s7 }
 0x2e7   : > { %p2761_p7 = pnand %p2760_p6, %p2899_p4 }
 0x2e8   : > { %p2766_p12 = por %p2765_p11, %p2764_p10 }
 0x2e9   : > { %p2762_p9 = pneg %p2761_p7 }
 0x2ea   : > { %p2768_p0 = por %p2767_p13, %p2766_p12 }
 0x2ec   : > { %p2769_p1 = pnand %p2768_p0, %p2762_p9 }
 0x2ee   : > { %2772 = shalt.err (!%p2769_p1)
}
 0x2ef   : > { %2652 = dma.vmem_to_hbm [thread:$0]  (%p2899_p4), %s4316_s4, 256, %s4314_s7, %s2502_s8  }
 0x2f0 PF: > { %p2658_p2 = scmp.ge.s32.totalorder %s2823_s17, 2  ;;  %s2532_s28 = sand.u32 1, %s2803_s12  }
 0x2f1   : > { %s2533_s29 = scalar_lea.sflag [#allocation4], %s2532_s28 }
 0x2f2   : > { %p2655_p3 = pnand %p2658_p2, %p2906_p8 }
 0x2f4   : > { %2798 = dma.done.wait (!%p2655_p3), %s2533_s29, 256  }
 0x2f5   : > { %2800 = vsyncadd (!%p2655_p3), %s2533_s29, 4294967040  ;;  %s16_s17 = sadd.s32 1, %s2823_s17   ;;  %s4459_s12 = smov %s2807_s13 }
 0x2f6   : > { %p13_p5 = scmp.ge.s32.totalorder %s16_s17, 4   ;;  %s4460_s13 = smov %s2811_s14 }
 0x2f7   : > { %s4461_s14 = smov %s2912_s25  ;;  %s4462_s15 = smov %s2819_s16 }
 0x2f8   : > { %s4463_s16 = smov %s4465_s20  ;;  %15 = sbr.rel (!%p13_p5) target bundleno = 4 (0x4), region = 77 }
 0x2ff   :  { %2538 = vsyncpa [#allocation4], 1 }
 0x300   :  { %2540 = vsyncpa [#allocation4 + $0x1], 1 }

</bundles_post_ra>
